<compile_context>
chip_gen: v6e
topology: v6e:2x2x1
jax: 0.10.0
libtpu: 0.0.40
codegen_flags: <defaults>
</compile_context>

<pallas_src>
import functools

import jax
import jax.numpy as jnp
from jax.experimental import pallas as pl
from jax.experimental.pallas import tpu as pltpu


def lstm_fused_kernel(tok_ref, gx_ref, whh_ref, out_ref, cn_ref, *,
                      hidden_size, batch, seq_len):
    """Entire Encoder.forward (embedding gather + LSTM recurrence), one call.

    tok_ref : (B*T,)      int32  SMEM  tokens, row-major (b, t) flatten
    gx_ref  : (vocab, 4H) f32    VMEM  emb @ W_ih^T + (b_ih+b_hh), gate order (i,f,o,g)
    whh_ref : (H, 4H)     f32    VMEM  W_hh^T, same gate column order
    out_ref : (T*B, H)    f32    VMEM  per-step hidden states, time-major
    cn_ref  : (B, H)      f32    VMEM  final cell state
    """
    H = hidden_size
    B = batch
    T = seq_len

    # Recurrent weights loaded into vregs once, outside the recurrence.
    whh = whh_ref[...]                                        # (H, 4H)

    h = jnp.zeros((B, H), jnp.float32)
    c = jnp.zeros((B, H), jnp.float32)
    h_steps = []

    # T is static and tiny -> fully unrolled serial recurrence over h, c.
    for t in range(T):
        # In-kernel gather of the precomputed input projection for this step:
        # one dynamic row load per (t, b); independent of the h/c chain.
        rows = [gx_ref[pl.ds(tok_ref[b * T + t], 1), :] for b in range(B)]
        gx_t = rows[0] if B == 1 else jnp.concatenate(rows, axis=0)   # (B, 4H)

        # Only the recurrent matmul + gate math sit on the serial chain.
        gates = gx_t + jnp.dot(h, whh,
                               precision=jax.lax.Precision.HIGHEST,
                               preferred_element_type=jnp.float32)    # (B, 4H)

        # Gate order (i, f, o, g): one sigmoid over the first 3H lanes, one
        # tanh over the last H lanes.
        sig = jax.nn.sigmoid(gates[:, :3 * H])
        i_g = sig[:, 0 * H:1 * H]
        f_g = sig[:, 1 * H:2 * H]
        o_g = sig[:, 2 * H:3 * H]
        g_g = jnp.tanh(gates[:, 3 * H:4 * H])

        c = f_g * c + i_g * g_g
        h = o_g * jnp.tanh(c)
        h_steps.append(h)

    # Single dense store of all per-step hidden states (no per-step masked
    # stores).  h_n == out[-1] is recovered in the wrapper (no hn output).
    out_ref[...] = jnp.concatenate(h_steps, axis=0)          # (T*B, H)
    cn_ref[...] = c


def precompute_encoder_params(emb_weight, w_ih, w_hh, b_ih, b_hh, hidden_size):
    """Once-per-parameter-set precompute (not per forward call).

    Fuses embedding + input projection into a (vocab, 4H) lookup table and
    reorders the PyTorch gate blocks (i, f, g, o) -> (i, f, o, g).
    """
    H = hidden_size
    perm = jnp.concatenate([jnp.arange(0, 2 * H),          # i, f
                            jnp.arange(3 * H, 4 * H),      # o
                            jnp.arange(2 * H, 3 * H)])     # g
    w_ih_r = w_ih[perm].astype(jnp.float32)                # (4H, E)
    w_hh_r = w_hh[perm].astype(jnp.float32)                # (4H, H)
    bias_r = (b_ih + b_hh)[perm].astype(jnp.float32)       # (4H,)

    # (emb[token] @ W_ih^T + b) == (emb @ W_ih^T + b)[token]: one matmul over
    # the whole vocab.  Explicit HIGHEST precision (no global-flag dependence).
    gx_table = jnp.dot(emb_weight.astype(jnp.float32), w_ih_r.T,
                       precision=jax.lax.Precision.HIGHEST,
                       preferred_element_type=jnp.float32) + bias_r   # (vocab, 4H)
    whh = jnp.transpose(w_hh_r)                                        # (H, 4H)
    return gx_table, whh


@functools.partial(jax.jit, static_argnums=(3,))
def encoder_forward(tokens, gx_table, whh, hidden_size):
    """Encoder.forward: a single fused pallas_call (gather + LSTM)."""
    B, T = tokens.shape
    H = hidden_size

    # Row-major flatten is a metadata-only reshape: index = b*T + t.
    tokens_flat = tokens.reshape(-1).astype(jnp.int32)     # (B*T,)

    out_flat, c_n = pl.pallas_call(
        functools.partial(lstm_fused_kernel,
                          hidden_size=H, batch=B, seq_len=T),
        out_shape=(
            jax.ShapeDtypeStruct((T * B, H), jnp.float32),   # hidden states
            jax.ShapeDtypeStruct((B, H), jnp.float32),       # c_n (squeezed)
        ),
        # Single grid-less invocation: everything fully resident in VMEM/SMEM.
        in_specs=[
            pl.BlockSpec(memory_space=pltpu.MemorySpace.SMEM),   # tokens
            pl.BlockSpec(memory_space=pltpu.MemorySpace.VMEM),   # gx_table
            pl.BlockSpec(memory_space=pltpu.MemorySpace.VMEM),   # W_hh^T
        ],
        out_specs=(
            pl.BlockSpec(memory_space=pltpu.MemorySpace.VMEM),
            pl.BlockSpec(memory_space=pltpu.MemorySpace.VMEM),
        ),
    )(tokens_flat, gx_table, whh)

    out = out_flat.reshape(T, B, H)        # time-major, matches nn.LSTM output
    h_n = out[T - 1]                       # last hidden state == h_n
    return out, (h_n[None, :, :], c_n[None, :, :])


def encoder_reference(tokens, emb_weight, w_ih, w_hh, b_ih, b_hh, hidden_size):
    """Pure-JAX reference (lax.scan) for correctness checking."""
    B, _ = tokens.shape
    H = hidden_size
    x = jnp.take(emb_weight, tokens, axis=0)
    x = jnp.transpose(x, (1, 0, 2)).astype(jnp.float32)    # (T, B, E)

    def step(carry, x_t):
        h, c = carry
        gates = (jnp.dot(x_t, w_ih.T, precision=jax.lax.Precision.HIGHEST)
                 + jnp.dot(h, w_hh.T, precision=jax.lax.Precision.HIGHEST)
                 + b_ih + b_hh)
        i_g = jax.nn.sigmoid(gates[:, 0 * H:1 * H])
        f_g = jax.nn.sigmoid(gates[:, 1 * H:2 * H])
        g_g = jnp.tanh(gates[:, 2 * H:3 * H])
        o_g = jax.nn.sigmoid(gates[:, 3 * H:4 * H])
        c_new = f_g * c + i_g * g_g
        h_new = o_g * jnp.tanh(c_new)
        return (h_new, c_new), h_new

    h0 = jnp.zeros((B, H), jnp.float32)
    c0 = jnp.zeros((B, H), jnp.float32)
    (h_n, c_n), out = jax.lax.scan(step, (h0, c0), x)
    return out, (h_n[None], c_n[None])


if __name__ == "__main__":
    # Small shapes consistent with the module: tokens (batch, seq)
    batch, seq = 2, 8
    vocab_size, embedding_dim, hidden_size = 50, 16, 32

    key = jax.random.PRNGKey(0)
    k_emb, k_wih, k_whh, k_bih, k_bhh, k_tok = jax.random.split(key, 6)

    # Deterministic parameter init (PyTorch-like uniform(-1/sqrt(H), 1/sqrt(H)))
    bound = 1.0 / (hidden_size ** 0.5)
    emb_weight = jax.random.normal(k_emb, (vocab_size, embedding_dim), jnp.float32)
    w_ih = jax.random.uniform(k_wih, (4 * hidden_size, embedding_dim),
                              jnp.float32, -bound, bound)
    w_hh = jax.random.uniform(k_whh, (4 * hidden_size, hidden_size),
                              jnp.float32, -bound, bound)
    b_ih = jax.random.uniform(k_bih, (4 * hidden_size,), jnp.float32, -bound, bound)
    b_hh = jax.random.uniform(k_bhh, (4 * hidden_size,), jnp.float32, -bound, bound)

    tokens = jax.random.randint(k_tok, (batch, seq), 0, vocab_size, jnp.int32)

    # Once-per-parameter-set precompute (kept out of the forward path).
    gx_table, whh = precompute_encoder_params(emb_weight, w_ih, w_hh,
                                              b_ih, b_hh, hidden_size)

    out, (h_n, c_n) = encoder_forward(tokens, gx_table, whh, hidden_size)
    jax.block_until_ready((out, h_n, c_n))

    # Verify against pure-JAX reference
    out_r, (h_r, c_r) = encoder_reference(tokens, emb_weight, w_ih, w_hh,
                                          b_ih, b_hh, hidden_size)
    assert out.shape == (seq, batch, hidden_size)
    assert h_n.shape == (1, batch, hidden_size)
    assert c_n.shape == (1, batch, hidden_size)
    assert jnp.allclose(out, out_r, atol=1e-5, rtol=1e-5)
    assert jnp.allclose(h_n, h_r, atol=1e-5, rtol=1e-5)
    assert jnp.allclose(c_n, c_r, atol=1e-5, rtol=1e-5)

    print("KERNEL_OK")
</pallas_src>

<mosaic_0001>
module attributes {stable_mosaic.version = 11 : i64} {
  func.func @lstm_fused_kernel(%arg0: memref<16xi32, #tpu.memory_space<smem>>, %arg1: memref<50x128xf32, #tpu.memory_space<vmem>>, %arg2: memref<32x128xf32, #tpu.memory_space<vmem>>, %arg3: memref<16x32xf32, #tpu.memory_space<vmem>>, %arg4: memref<2x32xf32, #tpu.memory_space<vmem>>) attributes {dimension_semantics = [], scalar_prefetch = 0 : i64, scratch_operands = 0 : i64, tpu.core_type = #tpu.core_type<tc>} {
    %c0 = arith.constant 0 : index
    %c0_0 = arith.constant 0 : index
    %0 = vector.load %arg2[%c0, %c0_0] : memref<32x128xf32, #tpu.memory_space<vmem>>, vector<32x128xf32>
    %cst = arith.constant 0.000000e+00 : f32
    %1 = vector.broadcast %cst : f32 to vector<2x32xf32>
    %cst_1 = arith.constant 0.000000e+00 : f32
    %2 = vector.broadcast %cst_1 : f32 to vector<2x32xf32>
    %c0_2 = arith.constant 0 : index
    %3 = memref.load %arg0[%c0_2] : memref<16xi32, #tpu.memory_space<smem>>
    %4 = arith.index_cast %3 : i32 to index
    %c0_3 = arith.constant 0 : index
    %5 = vector.load %arg1[%4, %c0_3] : memref<50x128xf32, #tpu.memory_space<vmem>>, vector<1x128xf32>
    %c8 = arith.constant 8 : index
    %6 = memref.load %arg0[%c8] : memref<16xi32, #tpu.memory_space<smem>>
    %7 = arith.index_cast %6 : i32 to index
    %c0_4 = arith.constant 0 : index
    %8 = vector.load %arg1[%7, %c0_4] : memref<50x128xf32, #tpu.memory_space<vmem>>, vector<1x128xf32>
    %9 = tpu.concatenate %5, %8 in 0 : vector<1x128xf32>, vector<1x128xf32> -> vector<2x128xf32>
    %cst_5 = arith.constant dense<0.000000e+00> : vector<2x128xf32>
    %10 = tpu.matmul %1, %0, %cst_5 {dimension_numbers = #tpu.dot_dimension_numbers<[1], [0], [0], [1], [0, 0, 1, 1], [], []>, precision = #tpu.contract_precision<fp32>} : vector<2x32xf32>, vector<32x128xf32>, vector<2x128xf32> -> vector<2x128xf32>
    %11 = arith.addf %9, %10 : vector<2x128xf32>
    %12 = vector.extract_strided_slice %11 {offsets = [0, 0], sizes = [2, 96], strides = [1, 1]} : vector<2x128xf32> to vector<2x96xf32>
    %13 = arith.negf %12 : vector<2x96xf32>
    %14 = math.exp %13 : vector<2x96xf32>
    %cst_6 = arith.constant 1.000000e+00 : f32
    %15 = vector.broadcast %cst_6 : f32 to vector<2x96xf32>
    %16 = arith.addf %15, %14 : vector<2x96xf32>
    %17 = arith.divf %15, %16 : vector<2x96xf32>
    %18 = vector.extract_strided_slice %17 {offsets = [0, 0], sizes = [2, 32], strides = [1, 1]} : vector<2x96xf32> to vector<2x32xf32>
    %19 = vector.extract_strided_slice %17 {offsets = [0, 32], sizes = [2, 32], strides = [1, 1]} : vector<2x96xf32> to vector<2x32xf32>
    %20 = vector.extract_strided_slice %17 {offsets = [0, 64], sizes = [2, 32], strides = [1, 1]} : vector<2x96xf32> to vector<2x32xf32>
    %21 = vector.extract_strided_slice %11 {offsets = [0, 96], sizes = [2, 32], strides = [1, 1]} : vector<2x128xf32> to vector<2x32xf32>
    %22 = math.tanh %21 : vector<2x32xf32>
    %23 = arith.mulf %19, %2 : vector<2x32xf32>
    %24 = arith.mulf %18, %22 : vector<2x32xf32>
    %25 = arith.addf %23, %24 : vector<2x32xf32>
    %26 = math.tanh %25 : vector<2x32xf32>
    %27 = arith.mulf %20, %26 : vector<2x32xf32>
    %c1 = arith.constant 1 : index
    %28 = memref.load %arg0[%c1] : memref<16xi32, #tpu.memory_space<smem>>
    %29 = arith.index_cast %28 : i32 to index
    %c0_7 = arith.constant 0 : index
    %30 = vector.load %arg1[%29, %c0_7] : memref<50x128xf32, #tpu.memory_space<vmem>>, vector<1x128xf32>
    %c9 = arith.constant 9 : index
    %31 = memref.load %arg0[%c9] : memref<16xi32, #tpu.memory_space<smem>>
    %32 = arith.index_cast %31 : i32 to index
    %c0_8 = arith.constant 0 : index
    %33 = vector.load %arg1[%32, %c0_8] : memref<50x128xf32, #tpu.memory_space<vmem>>, vector<1x128xf32>
    %34 = tpu.concatenate %30, %33 in 0 : vector<1x128xf32>, vector<1x128xf32> -> vector<2x128xf32>
    %cst_9 = arith.constant dense<0.000000e+00> : vector<2x128xf32>
    %35 = tpu.matmul %27, %0, %cst_9 {dimension_numbers = #tpu.dot_dimension_numbers<[1], [0], [0], [1], [0, 0, 1, 1], [], []>, precision = #tpu.contract_precision<fp32>} : vector<2x32xf32>, vector<32x128xf32>, vector<2x128xf32> -> vector<2x128xf32>
    %36 = arith.addf %34, %35 : vector<2x128xf32>
    %37 = vector.extract_strided_slice %36 {offsets = [0, 0], sizes = [2, 96], strides = [1, 1]} : vector<2x128xf32> to vector<2x96xf32>
    %38 = arith.negf %37 : vector<2x96xf32>
    %39 = math.exp %38 : vector<2x96xf32>
    %cst_10 = arith.constant 1.000000e+00 : f32
    %40 = vector.broadcast %cst_10 : f32 to vector<2x96xf32>
    %41 = arith.addf %40, %39 : vector<2x96xf32>
    %42 = arith.divf %40, %41 : vector<2x96xf32>
    %43 = vector.extract_strided_slice %42 {offsets = [0, 0], sizes = [2, 32], strides = [1, 1]} : vector<2x96xf32> to vector<2x32xf32>
    %44 = vector.extract_strided_slice %42 {offsets = [0, 32], sizes = [2, 32], strides = [1, 1]} : vector<2x96xf32> to vector<2x32xf32>
    %45 = vector.extract_strided_slice %42 {offsets = [0, 64], sizes = [2, 32], strides = [1, 1]} : vector<2x96xf32> to vector<2x32xf32>
    %46 = vector.extract_strided_slice %36 {offsets = [0, 96], sizes = [2, 32], strides = [1, 1]} : vector<2x128xf32> to vector<2x32xf32>
    %47 = math.tanh %46 : vector<2x32xf32>
    %48 = arith.mulf %44, %25 : vector<2x32xf32>
    %49 = arith.mulf %43, %47 : vector<2x32xf32>
    %50 = arith.addf %48, %49 : vector<2x32xf32>
    %51 = math.tanh %50 : vector<2x32xf32>
    %52 = arith.mulf %45, %51 : vector<2x32xf32>
    %c2 = arith.constant 2 : index
    %53 = memref.load %arg0[%c2] : memref<16xi32, #tpu.memory_space<smem>>
    %54 = arith.index_cast %53 : i32 to index
    %c0_11 = arith.constant 0 : index
    %55 = vector.load %arg1[%54, %c0_11] : memref<50x128xf32, #tpu.memory_space<vmem>>, vector<1x128xf32>
    %c10 = arith.constant 10 : index
    %56 = memref.load %arg0[%c10] : memref<16xi32, #tpu.memory_space<smem>>
    %57 = arith.index_cast %56 : i32 to index
    %c0_12 = arith.constant 0 : index
    %58 = vector.load %arg1[%57, %c0_12] : memref<50x128xf32, #tpu.memory_space<vmem>>, vector<1x128xf32>
    %59 = tpu.concatenate %55, %58 in 0 : vector<1x128xf32>, vector<1x128xf32> -> vector<2x128xf32>
    %cst_13 = arith.constant dense<0.000000e+00> : vector<2x128xf32>
    %60 = tpu.matmul %52, %0, %cst_13 {dimension_numbers = #tpu.dot_dimension_numbers<[1], [0], [0], [1], [0, 0, 1, 1], [], []>, precision = #tpu.contract_precision<fp32>} : vector<2x32xf32>, vector<32x128xf32>, vector<2x128xf32> -> vector<2x128xf32>
    %61 = arith.addf %59, %60 : vector<2x128xf32>
    %62 = vector.extract_strided_slice %61 {offsets = [0, 0], sizes = [2, 96], strides = [1, 1]} : vector<2x128xf32> to vector<2x96xf32>
    %63 = arith.negf %62 : vector<2x96xf32>
    %64 = math.exp %63 : vector<2x96xf32>
    %cst_14 = arith.constant 1.000000e+00 : f32
    %65 = vector.broadcast %cst_14 : f32 to vector<2x96xf32>
    %66 = arith.addf %65, %64 : vector<2x96xf32>
    %67 = arith.divf %65, %66 : vector<2x96xf32>
    %68 = vector.extract_strided_slice %67 {offsets = [0, 0], sizes = [2, 32], strides = [1, 1]} : vector<2x96xf32> to vector<2x32xf32>
    %69 = vector.extract_strided_slice %67 {offsets = [0, 32], sizes = [2, 32], strides = [1, 1]} : vector<2x96xf32> to vector<2x32xf32>
    %70 = vector.extract_strided_slice %67 {offsets = [0, 64], sizes = [2, 32], strides = [1, 1]} : vector<2x96xf32> to vector<2x32xf32>
    %71 = vector.extract_strided_slice %61 {offsets = [0, 96], sizes = [2, 32], strides = [1, 1]} : vector<2x128xf32> to vector<2x32xf32>
    %72 = math.tanh %71 : vector<2x32xf32>
    %73 = arith.mulf %69, %50 : vector<2x32xf32>
    %74 = arith.mulf %68, %72 : vector<2x32xf32>
    %75 = arith.addf %73, %74 : vector<2x32xf32>
    %76 = math.tanh %75 : vector<2x32xf32>
    %77 = arith.mulf %70, %76 : vector<2x32xf32>
    %c3 = arith.constant 3 : index
    %78 = memref.load %arg0[%c3] : memref<16xi32, #tpu.memory_space<smem>>
    %79 = arith.index_cast %78 : i32 to index
    %c0_15 = arith.constant 0 : index
    %80 = vector.load %arg1[%79, %c0_15] : memref<50x128xf32, #tpu.memory_space<vmem>>, vector<1x128xf32>
    %c11 = arith.constant 11 : index
    %81 = memref.load %arg0[%c11] : memref<16xi32, #tpu.memory_space<smem>>
    %82 = arith.index_cast %81 : i32 to index
    %c0_16 = arith.constant 0 : index
    %83 = vector.load %arg1[%82, %c0_16] : memref<50x128xf32, #tpu.memory_space<vmem>>, vector<1x128xf32>
    %84 = tpu.concatenate %80, %83 in 0 : vector<1x128xf32>, vector<1x128xf32> -> vector<2x128xf32>
    %cst_17 = arith.constant dense<0.000000e+00> : vector<2x128xf32>
    %85 = tpu.matmul %77, %0, %cst_17 {dimension_numbers = #tpu.dot_dimension_numbers<[1], [0], [0], [1], [0, 0, 1, 1], [], []>, precision = #tpu.contract_precision<fp32>} : vector<2x32xf32>, vector<32x128xf32>, vector<2x128xf32> -> vector<2x128xf32>
    %86 = arith.addf %84, %85 : vector<2x128xf32>
    %87 = vector.extract_strided_slice %86 {offsets = [0, 0], sizes = [2, 96], strides = [1, 1]} : vector<2x128xf32> to vector<2x96xf32>
    %88 = arith.negf %87 : vector<2x96xf32>
    %89 = math.exp %88 : vector<2x96xf32>
    %cst_18 = arith.constant 1.000000e+00 : f32
    %90 = vector.broadcast %cst_18 : f32 to vector<2x96xf32>
    %91 = arith.addf %90, %89 : vector<2x96xf32>
    %92 = arith.divf %90, %91 : vector<2x96xf32>
    %93 = vector.extract_strided_slice %92 {offsets = [0, 0], sizes = [2, 32], strides = [1, 1]} : vector<2x96xf32> to vector<2x32xf32>
    %94 = vector.extract_strided_slice %92 {offsets = [0, 32], sizes = [2, 32], strides = [1, 1]} : vector<2x96xf32> to vector<2x32xf32>
    %95 = vector.extract_strided_slice %92 {offsets = [0, 64], sizes = [2, 32], strides = [1, 1]} : vector<2x96xf32> to vector<2x32xf32>
    %96 = vector.extract_strided_slice %86 {offsets = [0, 96], sizes = [2, 32], strides = [1, 1]} : vector<2x128xf32> to vector<2x32xf32>
    %97 = math.tanh %96 : vector<2x32xf32>
    %98 = arith.mulf %94, %75 : vector<2x32xf32>
    %99 = arith.mulf %93, %97 : vector<2x32xf32>
    %100 = arith.addf %98, %99 : vector<2x32xf32>
    %101 = math.tanh %100 : vector<2x32xf32>
    %102 = arith.mulf %95, %101 : vector<2x32xf32>
    %c4 = arith.constant 4 : index
    %103 = memref.load %arg0[%c4] : memref<16xi32, #tpu.memory_space<smem>>
    %104 = arith.index_cast %103 : i32 to index
    %c0_19 = arith.constant 0 : index
    %105 = vector.load %arg1[%104, %c0_19] : memref<50x128xf32, #tpu.memory_space<vmem>>, vector<1x128xf32>
    %c12 = arith.constant 12 : index
    %106 = memref.load %arg0[%c12] : memref<16xi32, #tpu.memory_space<smem>>
    %107 = arith.index_cast %106 : i32 to index
    %c0_20 = arith.constant 0 : index
    %108 = vector.load %arg1[%107, %c0_20] : memref<50x128xf32, #tpu.memory_space<vmem>>, vector<1x128xf32>
    %109 = tpu.concatenate %105, %108 in 0 : vector<1x128xf32>, vector<1x128xf32> -> vector<2x128xf32>
    %cst_21 = arith.constant dense<0.000000e+00> : vector<2x128xf32>
    %110 = tpu.matmul %102, %0, %cst_21 {dimension_numbers = #tpu.dot_dimension_numbers<[1], [0], [0], [1], [0, 0, 1, 1], [], []>, precision = #tpu.contract_precision<fp32>} : vector<2x32xf32>, vector<32x128xf32>, vector<2x128xf32> -> vector<2x128xf32>
    %111 = arith.addf %109, %110 : vector<2x128xf32>
    %112 = vector.extract_strided_slice %111 {offsets = [0, 0], sizes = [2, 96], strides = [1, 1]} : vector<2x128xf32> to vector<2x96xf32>
    %113 = arith.negf %112 : vector<2x96xf32>
    %114 = math.exp %113 : vector<2x96xf32>
    %cst_22 = arith.constant 1.000000e+00 : f32
    %115 = vector.broadcast %cst_22 : f32 to vector<2x96xf32>
    %116 = arith.addf %115, %114 : vector<2x96xf32>
    %117 = arith.divf %115, %116 : vector<2x96xf32>
    %118 = vector.extract_strided_slice %117 {offsets = [0, 0], sizes = [2, 32], strides = [1, 1]} : vector<2x96xf32> to vector<2x32xf32>
    %119 = vector.extract_strided_slice %117 {offsets = [0, 32], sizes = [2, 32], strides = [1, 1]} : vector<2x96xf32> to vector<2x32xf32>
    %120 = vector.extract_strided_slice %117 {offsets = [0, 64], sizes = [2, 32], strides = [1, 1]} : vector<2x96xf32> to vector<2x32xf32>
    %121 = vector.extract_strided_slice %111 {offsets = [0, 96], sizes = [2, 32], strides = [1, 1]} : vector<2x128xf32> to vector<2x32xf32>
    %122 = math.tanh %121 : vector<2x32xf32>
    %123 = arith.mulf %119, %100 : vector<2x32xf32>
    %124 = arith.mulf %118, %122 : vector<2x32xf32>
    %125 = arith.addf %123, %124 : vector<2x32xf32>
    %126 = math.tanh %125 : vector<2x32xf32>
    %127 = arith.mulf %120, %126 : vector<2x32xf32>
    %c5 = arith.constant 5 : index
    %128 = memref.load %arg0[%c5] : memref<16xi32, #tpu.memory_space<smem>>
    %129 = arith.index_cast %128 : i32 to index
    %c0_23 = arith.constant 0 : index
    %130 = vector.load %arg1[%129, %c0_23] : memref<50x128xf32, #tpu.memory_space<vmem>>, vector<1x128xf32>
    %c13 = arith.constant 13 : index
    %131 = memref.load %arg0[%c13] : memref<16xi32, #tpu.memory_space<smem>>
    %132 = arith.index_cast %131 : i32 to index
    %c0_24 = arith.constant 0 : index
    %133 = vector.load %arg1[%132, %c0_24] : memref<50x128xf32, #tpu.memory_space<vmem>>, vector<1x128xf32>
    %134 = tpu.concatenate %130, %133 in 0 : vector<1x128xf32>, vector<1x128xf32> -> vector<2x128xf32>
    %cst_25 = arith.constant dense<0.000000e+00> : vector<2x128xf32>
    %135 = tpu.matmul %127, %0, %cst_25 {dimension_numbers = #tpu.dot_dimension_numbers<[1], [0], [0], [1], [0, 0, 1, 1], [], []>, precision = #tpu.contract_precision<fp32>} : vector<2x32xf32>, vector<32x128xf32>, vector<2x128xf32> -> vector<2x128xf32>
    %136 = arith.addf %134, %135 : vector<2x128xf32>
    %137 = vector.extract_strided_slice %136 {offsets = [0, 0], sizes = [2, 96], strides = [1, 1]} : vector<2x128xf32> to vector<2x96xf32>
    %138 = arith.negf %137 : vector<2x96xf32>
    %139 = math.exp %138 : vector<2x96xf32>
    %cst_26 = arith.constant 1.000000e+00 : f32
    %140 = vector.broadcast %cst_26 : f32 to vector<2x96xf32>
    %141 = arith.addf %140, %139 : vector<2x96xf32>
    %142 = arith.divf %140, %141 : vector<2x96xf32>
    %143 = vector.extract_strided_slice %142 {offsets = [0, 0], sizes = [2, 32], strides = [1, 1]} : vector<2x96xf32> to vector<2x32xf32>
    %144 = vector.extract_strided_slice %142 {offsets = [0, 32], sizes = [2, 32], strides = [1, 1]} : vector<2x96xf32> to vector<2x32xf32>
    %145 = vector.extract_strided_slice %142 {offsets = [0, 64], sizes = [2, 32], strides = [1, 1]} : vector<2x96xf32> to vector<2x32xf32>
    %146 = vector.extract_strided_slice %136 {offsets = [0, 96], sizes = [2, 32], strides = [1, 1]} : vector<2x128xf32> to vector<2x32xf32>
    %147 = math.tanh %146 : vector<2x32xf32>
    %148 = arith.mulf %144, %125 : vector<2x32xf32>
    %149 = arith.mulf %143, %147 : vector<2x32xf32>
    %150 = arith.addf %148, %149 : vector<2x32xf32>
    %151 = math.tanh %150 : vector<2x32xf32>
    %152 = arith.mulf %145, %151 : vector<2x32xf32>
    %c6 = arith.constant 6 : index
    %153 = memref.load %arg0[%c6] : memref<16xi32, #tpu.memory_space<smem>>
    %154 = arith.index_cast %153 : i32 to index
    %c0_27 = arith.constant 0 : index
    %155 = vector.load %arg1[%154, %c0_27] : memref<50x128xf32, #tpu.memory_space<vmem>>, vector<1x128xf32>
    %c14 = arith.constant 14 : index
    %156 = memref.load %arg0[%c14] : memref<16xi32, #tpu.memory_space<smem>>
    %157 = arith.index_cast %156 : i32 to index
    %c0_28 = arith.constant 0 : index
    %158 = vector.load %arg1[%157, %c0_28] : memref<50x128xf32, #tpu.memory_space<vmem>>, vector<1x128xf32>
    %159 = tpu.concatenate %155, %158 in 0 : vector<1x128xf32>, vector<1x128xf32> -> vector<2x128xf32>
    %cst_29 = arith.constant dense<0.000000e+00> : vector<2x128xf32>
    %160 = tpu.matmul %152, %0, %cst_29 {dimension_numbers = #tpu.dot_dimension_numbers<[1], [0], [0], [1], [0, 0, 1, 1], [], []>, precision = #tpu.contract_precision<fp32>} : vector<2x32xf32>, vector<32x128xf32>, vector<2x128xf32> -> vector<2x128xf32>
    %161 = arith.addf %159, %160 : vector<2x128xf32>
    %162 = vector.extract_strided_slice %161 {offsets = [0, 0], sizes = [2, 96], strides = [1, 1]} : vector<2x128xf32> to vector<2x96xf32>
    %163 = arith.negf %162 : vector<2x96xf32>
    %164 = math.exp %163 : vector<2x96xf32>
    %cst_30 = arith.constant 1.000000e+00 : f32
    %165 = vector.broadcast %cst_30 : f32 to vector<2x96xf32>
    %166 = arith.addf %165, %164 : vector<2x96xf32>
    %167 = arith.divf %165, %166 : vector<2x96xf32>
    %168 = vector.extract_strided_slice %167 {offsets = [0, 0], sizes = [2, 32], strides = [1, 1]} : vector<2x96xf32> to vector<2x32xf32>
    %169 = vector.extract_strided_slice %167 {offsets = [0, 32], sizes = [2, 32], strides = [1, 1]} : vector<2x96xf32> to vector<2x32xf32>
    %170 = vector.extract_strided_slice %167 {offsets = [0, 64], sizes = [2, 32], strides = [1, 1]} : vector<2x96xf32> to vector<2x32xf32>
    %171 = vector.extract_strided_slice %161 {offsets = [0, 96], sizes = [2, 32], strides = [1, 1]} : vector<2x128xf32> to vector<2x32xf32>
    %172 = math.tanh %171 : vector<2x32xf32>
    %173 = arith.mulf %169, %150 : vector<2x32xf32>
    %174 = arith.mulf %168, %172 : vector<2x32xf32>
    %175 = arith.addf %173, %174 : vector<2x32xf32>
    %176 = math.tanh %175 : vector<2x32xf32>
    %177 = arith.mulf %170, %176 : vector<2x32xf32>
    %c7 = arith.constant 7 : index
    %178 = memref.load %arg0[%c7] : memref<16xi32, #tpu.memory_space<smem>>
    %179 = arith.index_cast %178 : i32 to index
    %c0_31 = arith.constant 0 : index
    %180 = vector.load %arg1[%179, %c0_31] : memref<50x128xf32, #tpu.memory_space<vmem>>, vector<1x128xf32>
    %c15 = arith.constant 15 : index
    %181 = memref.load %arg0[%c15] : memref<16xi32, #tpu.memory_space<smem>>
    %182 = arith.index_cast %181 : i32 to index
    %c0_32 = arith.constant 0 : index
    %183 = vector.load %arg1[%182, %c0_32] : memref<50x128xf32, #tpu.memory_space<vmem>>, vector<1x128xf32>
    %184 = tpu.concatenate %180, %183 in 0 : vector<1x128xf32>, vector<1x128xf32> -> vector<2x128xf32>
    %cst_33 = arith.constant dense<0.000000e+00> : vector<2x128xf32>
    %185 = tpu.matmul %177, %0, %cst_33 {dimension_numbers = #tpu.dot_dimension_numbers<[1], [0], [0], [1], [0, 0, 1, 1], [], []>, precision = #tpu.contract_precision<fp32>} : vector<2x32xf32>, vector<32x128xf32>, vector<2x128xf32> -> vector<2x128xf32>
    %186 = arith.addf %184, %185 : vector<2x128xf32>
    %187 = vector.extract_strided_slice %186 {offsets = [0, 0], sizes = [2, 96], strides = [1, 1]} : vector<2x128xf32> to vector<2x96xf32>
    %188 = arith.negf %187 : vector<2x96xf32>
    %189 = math.exp %188 : vector<2x96xf32>
    %cst_34 = arith.constant 1.000000e+00 : f32
    %190 = vector.broadcast %cst_34 : f32 to vector<2x96xf32>
    %191 = arith.addf %190, %189 : vector<2x96xf32>
    %192 = arith.divf %190, %191 : vector<2x96xf32>
    %193 = vector.extract_strided_slice %192 {offsets = [0, 0], sizes = [2, 32], strides = [1, 1]} : vector<2x96xf32> to vector<2x32xf32>
    %194 = vector.extract_strided_slice %192 {offsets = [0, 32], sizes = [2, 32], strides = [1, 1]} : vector<2x96xf32> to vector<2x32xf32>
    %195 = vector.extract_strided_slice %192 {offsets = [0, 64], sizes = [2, 32], strides = [1, 1]} : vector<2x96xf32> to vector<2x32xf32>
    %196 = vector.extract_strided_slice %186 {offsets = [0, 96], sizes = [2, 32], strides = [1, 1]} : vector<2x128xf32> to vector<2x32xf32>
    %197 = math.tanh %196 : vector<2x32xf32>
    %198 = arith.mulf %194, %175 : vector<2x32xf32>
    %199 = arith.mulf %193, %197 : vector<2x32xf32>
    %200 = arith.addf %198, %199 : vector<2x32xf32>
    %201 = math.tanh %200 : vector<2x32xf32>
    %202 = arith.mulf %195, %201 : vector<2x32xf32>
    %203 = tpu.concatenate %27, %52, %77, %102, %127, %152, %177, %202 in 0 : vector<2x32xf32>, vector<2x32xf32>, vector<2x32xf32>, vector<2x32xf32>, vector<2x32xf32>, vector<2x32xf32>, vector<2x32xf32>, vector<2x32xf32> -> vector<16x32xf32>
    %c0_35 = arith.constant 0 : index
    %c0_36 = arith.constant 0 : index
    %204 = vector.load %arg3[%c0_35, %c0_36] : memref<16x32xf32, #tpu.memory_space<vmem>>, vector<16x32xf32>
    tpu.vector_store %arg3[%c0_35, %c0_36], %203 {strides = array<i32>} : memref<16x32xf32, #tpu.memory_space<vmem>>, vector<16x32xf32>,
    %c0_37 = arith.constant 0 : index
    %c0_38 = arith.constant 0 : index
    %205 = vector.load %arg4[%c0_37, %c0_38] : memref<2x32xf32, #tpu.memory_space<vmem>>, vector<2x32xf32>
    tpu.vector_store %arg4[%c0_37, %c0_38], %200 {strides = array<i32>} : memref<2x32xf32, #tpu.memory_space<vmem>>, vector<2x32xf32>,
    return
  }
}

</mosaic_0001>

<bundles_post_ra>
// kernel: encoder_forward.1
= control target key start
LH: loop header
LB: loop body
LE: loop exit
PB: predicated region body
PF: predicated region fallthrough
CT: control target
= control target key end

     0   :  { %10 = vsyncpa [#allocation5], 0  ;;  %s5980_s0 = inlined_call_operand.vmem [shape: s32[16], index: 0, kind: input, shape index: {}]   ;;  %s5981_s1 = inlined_call_operand.hbm [shape: f32[50,128], index: 1, kind: input, shape index: {}]   ;;  %s5982_s2 = inlined_call_operand.hbm [shape: f32[32,128], index: 2, kind: input, shape index: {}]   ;;  %s5983_s3 = inlined_call_operand.vmem [shape: f32[16,32], index: 3, kind: output, shape index: {0}]   ;;  %s5984_s4 = inlined_call_operand.hbm [shape: f32[2,32], index: 4, kind: output, shape index: {1}]  }
   0x1   :  { %11 = vsyncpa [#allocation3], 0 }
   0x2   :  { %12 = vsyncpa [#allocation8], 0 }
   0x3   :  { %13 = vsyncpa [#allocation4], 0  ;;  %s20_s17 = sshll.u32 %s5980_s0, 4  ;;  %s21_s17 = int_to_ptr.vmem [resolvable:$true] %s20_s17 }
   0x4   :  { %s5203_s18 = scalar_lea.vmem %s21_s17, 16  ;;  %p5208_p1 = scmp.lt.s32.totalorder %s21_s17, %s21_s17 }
   0x5   :  { %p5204_p0 = scmp.ne.s32.totalorder %s21_s17, %s5203_s18  ;;  %p5209_p2 = scmp.lt.s32.totalorder %s5203_s18, %s5203_s18 }
   0x7   :  { %p5210_p3 = por %p5209_p2, %p5208_p1 }
   0x9   :  { %p5211_p4 = pnand %p5210_p3, %p5204_p0 }
   0xb   :  { %5214 = shalt.err (!%p5211_p4)
}
   0xc   :  { %s5283_s19 = smov [#allocation2]   ;;  %s5284_s20 = smov [#allocation6]  }
   0xd   :  { %23 = dma.vmem_to_smem %s21_s17, 16, %s5283_s19, [#allocation5]  }
   0xe   :  { %s29_s21 = sshll.u32 %s5284_s20, 4  ;;  %s30_s21 = int_to_ptr.vmem [resolvable:$true] %s29_s21 }
   0xf   :  { %s5223_s22 = scalar_lea.vmem %s30_s21, 896  ;;  %p5228_p6 = scmp.lt.s32.totalorder %s30_s21, %s30_s21 }
  0x10   :  { %p5224_p5 = scmp.ne.s32.totalorder %s30_s21, %s5223_s22  ;;  %p5229_p7 = scmp.lt.s32.totalorder %s5223_s22, %s5223_s22 }
  0x12   :  { %p5230_p8 = por %p5229_p7, %p5228_p6 }
  0x14   :  { %p5231_p9 = pnand %p5230_p8, %p5224_p5 }
  0x16   :  { %5234 = shalt.err (!%p5231_p9)
}
  0x17   :  { %s5285_s0 = smov 128   ;;  %s5286_s23 = smov 8  }
  0x18   :  { %35 = dma.hbm_to_vmem [thread:$0]  %s5981_s1, 896, %s30_s21, [#allocation3], %s5285_s0, %s5285_s0, %s5286_s23  }
  0x19   :  { %s5287_s26 = smov [#allocation7]  }
  0x1a   :  { %s41_s27 = sshll.u32 %s5287_s26, 4  ;;  %s42_s27 = int_to_ptr.vmem [resolvable:$true] %s41_s27 }
  0x1b   :  { %s5243_s28 = scalar_lea.vmem %s42_s27, 512  ;;  %p5248_p11 = scmp.lt.s32.totalorder %s42_s27, %s42_s27 }
  0x1c   :  { %p5244_p10 = scmp.ne.s32.totalorder %s42_s27, %s5243_s28  ;;  %p5249_p12 = scmp.lt.s32.totalorder %s5243_s28, %s5243_s28 }
  0x1e   :  { %p5250_p13 = por %p5249_p12, %p5248_p11 }
  0x20   :  { %p5251_p0 = pnand %p5250_p13, %p5244_p10 }
  0x22   :  { %5254 = shalt.err (!%p5251_p0)
}
  0x23   :  { %47 = dma.hbm_to_vmem [thread:$0]  %s5982_s2, 512, %s42_s27, [#allocation8], %s5285_s0, %s5285_s0, %s5286_s23  }
  0x24   :  { %5275 = dma.done.wait [#allocation5], 16  }
  0x25   :  { %5276 = vsyncadd [#allocation5], 4294967280 }
  0x26   :  { %5277 = dma.done.wait [#allocation3], 896  }
  0x27   :  { %5278 = vsyncadd [#allocation3], 4294966400 }
  0x28   :  { %5279 = dma.done.wait [#allocation8], 512  }
  0x29   :  { %5280 = vsyncadd [#allocation8], 4294966784 }
  0x2a   :  { %57 = sfence }
  0x2b   :  { %v61_v0 = vld [vmem:[#allocation7 + $0x18] sm:$0xff]  ;;  %v60_v1 = vld [vmem:[#allocation7 + $0x10] sm:$0xff]  ;;  %v59_v2 = vld [vmem:[#allocation7 + $0x8] sm:$0xff]  ;;  %v5288_v3 = vmov 0.0   ;;  %vm5289_vm0 = vmmov 0   ;;  %s4337_s1 = sld [smem:[#allocation2 + $0x8]] }
  0x2c   :  { %4600 = vmatprep.subr.mxu0 %v5288_v3  ;;  %v5329_v4 = vand.u32 4294901760, %v61_v0  ;;  %v5331_v5 = vand.u32 4294901760, %v60_v1  ;;  %v5333_v6 = vand.u32 4294901760, %v59_v2  ;;  %4611 = vmatprep.subr.mxu1 %v5288_v3  ;;  %v58_v7 = vld [vmem:[#allocation7] sm:$0xff]  ;;  %s62_s2 = sld [smem:[#allocation2]]  ;;  %vm71_vm1 = vcmask 1040384  }
  0x2d   :  { %v5336_v8 = vand.u32 4294901760, %v58_v7  ;;  %4608 = vmatprep.mubr.msk.f32.mxu0 %vm5289_vm0, %v5288_v3  ;;  %4619 = vmatprep.mubr.msk.f32.mxu1 %vm5289_vm0, %v5288_v3  ;;  %s5290_s7 = smov 32   ;;  %s5291_s8 = smov 64   ;;  %vm73_vm2 = vcmask 261120   ;;  %vm4275_vm3 = vcmask 1041408   ;;  %vm4277_vm4 = vcmask 1043456  }
  0x2e   :  { %4601 = vmatpush3.msra.mxu0 %v5329_v4  ;;  %v5344_v9 = vsub.f32 %v61_v0, %v5329_v4  ;;  %v5347_v10 = vsub.f32 %v60_v1, %v5331_v5  ;;  %v5350_v11 = vsub.f32 %v59_v2, %v5333_v6  ;;  %s4340_s9 = sld [smem:[#allocation2 + $0x9]]  ;;  %vm4279_vm5 = vcmask 1045504  }
  0x2f   :  { %4602 = vmatprep.subr.mxu0 %v5288_v3  ;;  %v5354_v12 = vsub.f32 %v58_v7, %v5336_v8  ;;  %s4339_s10 = sld [smem:[#allocation2 + $0x1]]  ;;  %vm4298_vm6 = vcmask 254976  }
  0x30   :  { %4603 = vmatpush3.msra.mxu0 %v5331_v5  ;;  %v5358_v13 = vand.u32 4294901760, %v5344_v9  ;;  %v5361_v14 = vand.u32 4294901760, %v5347_v10  ;;  %v5364_v15 = vand.u32 4294901760, %v5350_v11  ;;  %s4343_s13 = sld [smem:[#allocation2 + $0xa]] }
  0x31   :  { %4604 = vmatprep.subr.mxu0 %v5288_v3  ;;  %v5368_v16 = vand.u32 4294901760, %v5354_v12  ;;  %s66_s5 = scalar_lea.vmem [#allocation6], %s4337_s1  ;;  %s4342_s14 = sld [smem:[#allocation2 + $0x2]] }
  0x32   :  { %4605 = vmatpush3.msra.mxu0 %v5333_v6  ;;  %v184_v17 = vsub.f32 %v5344_v9, %v5358_v13  ;;  %v191_v18 = vsub.f32 %v5347_v10, %v5361_v14  ;;  %v198_v19 = vsub.f32 %v5350_v11, %v5364_v15  ;;  %v67_v35 = vld [vmem:[%s66_s5] sm:$0x1]  ;;  %s63_s6 = scalar_lea.vmem [#allocation6], %s62_s2  ;;  %s4346_s17 = sld [smem:[#allocation2 + $0xb]] }
  0x33   :  { %4606 = vmatprep.subr.mxu0 %v5288_v3  ;;  %v205_v22 = vsub.f32 %v5354_v12, %v5368_v16  ;;  %v69_v39 = vrot.slane %v67_v35, 7  ;;  %v64_v40 = vld [vmem:[%s63_s6] sm:$0x1]  ;;  %s4345_s18 = sld [smem:[#allocation2 + $0x3]] }
  0x34   :  { %4607 = vmatpush3.msra.mxu0 %v5336_v8  ;;  %v5379_v20 = vand.u32 4294901760, %v184_v17  ;;  %v5381_v21 = vand.u32 4294901760, %v191_v18  ;;  %v5389_v23 = vand.u32 4294901760, %v198_v19  ;;  %s591_s11 = scalar_lea.vmem [#allocation6], %s4340_s9  ;;  %s4349_s21 = sld [smem:[#allocation2 + $0xc]] }
  0x35   :  { %4622 = vmatprep.subr.mxu0 %v5288_v3  ;;  %4609 = vmatmul.mubr.f32.vlgmr.msra.gmra.mxu0 %v5288_v3  ;;  %v5395_v24 = vand.u32 4294901760, %v205_v22  ;;  %v72_v42 = vsel %vm71_vm1, %v64_v40, %v69_v39  ;;  %s588_s12 = scalar_lea.vmem [#allocation6], %s4339_s10  ;;  %s4348_s22 = sld [smem:[#allocation2 + $0x4]] }
  0x36   :  { %4612 = vmatpush3.msra.mxu1 %v5379_v20  ;;  %4623 = vmatpush3.msra.mxu0 %v5344_v9  ;;  %s1116_s15 = scalar_lea.vmem [#allocation6], %s4343_s13  ;;  %s4352_s24 = sld [smem:[#allocation2 + $0xd]] }
  0x37   :  { %4613 = vmatprep.subr.mxu1 %v5288_v3  ;;  %4624 = vmatprep.subr.mxu0 %v5288_v3  ;;  %s1113_s16 = scalar_lea.vmem [#allocation6], %s4342_s14  ;;  %s4351_s25 = sld [smem:[#allocation2 + $0x5]] }
  0x38   :  { %4614 = vmatpush3.msra.mxu1 %v5381_v21  ;;  %4625 = vmatpush3.msra.mxu0 %v5347_v10  ;;  %s1641_s19 = scalar_lea.vmem [#allocation6], %s4346_s17  ;;  %s4355_s28 = sld [smem:[#allocation2 + $0xe]] }
  0x39   :  { %4615 = vmatprep.subr.mxu1 %v5288_v3  ;;  %4626 = vmatprep.subr.mxu0 %v5288_v3  ;;  %s1638_s20 = scalar_lea.vmem [#allocation6], %s4345_s18  ;;  %s4354_s29 = sld [smem:[#allocation2 + $0x6]] }
  0x3a   :  { %4616 = vmatpush3.msra.mxu1 %v5389_v23  ;;  %4627 = vmatpush3.msra.mxu0 %v5350_v11  ;;  %s2166_s0 = scalar_lea.vmem [#allocation6], %s4349_s21  ;;  %s4358_s2 = sld [smem:[#allocation2 + $0xf]] }
  0x3b   :  { %4617 = vmatprep.subr.mxu1 %v5288_v3  ;;  %4628 = vmatprep.subr.mxu0 %v5288_v3  ;;  %s2163_s23 = scalar_lea.vmem [#allocation6], %s4348_s22  ;;  %s4357_s5 = sld [smem:[#allocation2 + $0x7]] }
  0x3c   :  { %4618 = vmatpush3.msra.mxu1 %v5395_v24  ;;  %4629 = vmatpush3.msra.mxu0 %v5354_v12  ;;  %s2691_s26 = scalar_lea.vmem [#allocation6], %s4352_s24  ;;  %s5292_s10 = smov 96  }
  0x3d   :  { %4620 = vmatmul.mubr.f32.vlgmr.msra.gmra.mxu1 %v5288_v3  ;;  %4633 = vmatprep.subr.mxu1 %v5288_v3  ;;  %s2688_s27 = scalar_lea.vmem [#allocation6], %s4351_s25 }
  0x3e   :  { %4630 = vmatprep.mubr.msk.f32.mxu0 %vm5289_vm0, %v5288_v3  ;;  %4634 = vmatpush3.msra.mxu1 %v5329_v4  ;;  %s3216_s30 = scalar_lea.vmem [#allocation6], %s4355_s28 }
  0x3f   :  { %4631 = vmatmul.mubr.f32.vlgmr.msra.gmra.mxu0 %v5288_v3  ;;  %4635 = vmatprep.subr.mxu1 %v5288_v3  ;;  %s3213_s1 = scalar_lea.vmem [#allocation6], %s4354_s29 }
  0x40   :  { %4644 = vmatprep.subr.mxu0 %v5288_v3  ;;  %4636 = vmatpush3.msra.mxu1 %v5331_v5  ;;  %s3741_s6 = scalar_lea.vmem [#allocation6], %s4358_s2 }
  0x41   :  { %4645 = vmatpush3.msra.mxu0 %v5358_v13  ;;  %4637 = vmatprep.subr.mxu1 %v5288_v3  ;;  %s3738_s9 = scalar_lea.vmem [#allocation6], %s4357_s5 }
  0x42   :  { %4646 = vmatprep.subr.mxu0 %v5288_v3  ;;  %4638 = vmatpush3.msra.mxu1 %v5333_v6 }
  0x43   :  { %4647 = vmatpush3.msra.mxu0 %v5361_v14  ;;  %4639 = vmatprep.subr.mxu1 %v5288_v3 }
  0x44   :  { %4648 = vmatprep.subr.mxu0 %v5288_v3  ;;  %4640 = vmatpush3.msra.mxu1 %v5336_v8 }
  0x45   :  { %4641 = vmatprep.mubr.msk.f32.mxu1 %vm5289_vm0, %v5288_v3  ;;  %4649 = vmatpush3.msra.mxu0 %v5364_v15 }
  0x46   :  { %4642 = vmatmul.mubr.f32.vlgmr.msra.gmra.mxu1 %v5288_v3  ;;  %4650 = vmatprep.subr.mxu0 %v5288_v3 }
  0x47   :  { %4655 = vmatprep.subr.mxu1 %v5288_v3  ;;  %4651 = vmatpush3.msra.mxu0 %v5368_v16 }
  0x48   :  { %4652 = vmatprep.mubr.msk.f32.mxu0 %vm5289_vm0, %v5288_v3  ;;  %4656 = vmatpush3.msra.mxu1 %v5329_v4 }
  0x49   :  { %4653 = vmatmul.mubr.f32.vlgmr.msra.gmra.mxu0 %v5288_v3  ;;  %4657 = vmatprep.subr.mxu1 %v5288_v3 }
  0x4a   :  { %4658 = vmatpush3.msra.mxu1 %v5331_v5  ;;  %4663 = vmatprep.mubr.msk.f32.mxu1 %vm5289_vm0, %v5288_v3 }
  0x4b   :  { %4659 = vmatprep.subr.mxu1 %v5288_v3  ;;  %4666 = vmatprep.subr.mxu0 %v5288_v3 }
  0x4c   :  { %4660 = vmatpush3.msra.mxu1 %v5333_v6  ;;  %4667 = vmatpush3.msra.mxu0 %v5329_v4 }
  0x4d   :  { %4661 = vmatprep.subr.mxu1 %v5288_v3  ;;  %4668 = vmatprep.subr.mxu0 %v5288_v3 }
  0x4e   :  { %4662 = vmatpush3.msra.mxu1 %v5336_v8  ;;  %4669 = vmatpush3.msra.mxu0 %v5331_v5 }
  0x4f   :  { %4664 = vmatmul.mubr.f32.vlgmr.msra.gmra.mxu1 %v5288_v3  ;;  %4677 = vmatprep.subr.mxu1 %v5288_v3 }
  0x50   :  { %4678 = vmatpush3.msra.mxu1 %v5379_v20  ;;  %4685 = vmatprep.mubr.msk.f32.mxu1 %vm5289_vm0, %v5288_v3 }
  0x51   :  { %4679 = vmatprep.subr.mxu1 %v5288_v3  ;;  %4670 = vmatprep.subr.mxu0 %v5288_v3 }
  0x52   :  { %4680 = vmatpush3.msra.mxu1 %v5381_v21  ;;  %4671 = vmatpush3.msra.mxu0 %v5333_v6 }
  0x53   :  { %4681 = vmatprep.subr.mxu1 %v5288_v3  ;;  %4672 = vmatprep.subr.mxu0 %v5288_v3 }
  0x54   :  { %4682 = vmatpush3.msra.mxu1 %v5389_v23  ;;  %4673 = vmatpush3.msra.mxu0 %v5336_v8 }
  0x55   :  { %4683 = vmatprep.subr.mxu1 %v5288_v3  ;;  %4674 = vmatprep.mubr.msk.f32.mxu0 %vm5289_vm0, %v5288_v3 }
  0x56   :  { %4684 = vmatpush3.msra.mxu1 %v5395_v24  ;;  %4688 = vmatprep.subr.mxu0 %v5288_v3 }
  0x57   :  { %4699 = vmatprep.subr.mxu1 %v5288_v3 }
  0xf5   :  { %v152_v25 = vpop.f32.mrf.mxu0 }
  0xf7   :  { %v4610_v26 = vpop.f32.mrf.mxu0 }
  0xfd   :  { %v243_v27 = vpop.f32.mrf.mxu1 }
  0xfe   :  { %v244_v31 = vadd.f32 %v243_v27, %v152_v25 }
  0xff   :  { %v4621_v28 = vpop.f32.mrf.mxu1  ;;  %v323_v29 = vpop.f32.mrf.mxu0 }
 0x100   :  { %v324_v33 = vadd.f32 %v323_v29, %v244_v31 }
 0x101   :  { %v4632_v30 = vpop.f32.mrf.mxu0 }
 0x106   :  { %v400_v32 = vpop.f32.mrf.mxu1 }
 0x107   :  { %v401_v37 = vadd.f32 %v400_v32, %v324_v33  ;;  %v592_v32 = vld [vmem:[%s591_s11] sm:$0x1]  ;;  %s5293_s11 = smov [#allocation9]  }
 0x108   :  { %v4643_v34 = vpop.f32.mrf.mxu1  ;;  %v594_v33 = vrot.slane %v592_v32, 7 }
 0x109   :  { %v483_v36 = vpop.f32.mrf.mxu0  ;;  %v589_v34 = vld [vmem:[%s588_s12] sm:$0x1]  ;;  %s4308_s12 = sshll.u32 %s5293_s11, 4  ;;  %s4309_s12 = int_to_ptr.vmem [resolvable:$true] %s4308_s12 }
 0x10a   :  { %v484_v41 = vadd.f32 %v483_v36, %v401_v37  ;;  %s5255_s13 = scalar_lea.vmem %s4309_s12, 32  ;;  %p5260_p2 = scmp.lt.s32.totalorder %s4309_s12, %s4309_s12 }
 0x10b   :  { %v4654_v38 = vpop.f32.mrf.mxu0  ;;  %p5256_p1 = scmp.ne.s32.totalorder %s4309_s12, %s5255_s13  ;;  %p5261_p3 = scmp.lt.s32.totalorder %s5255_s13, %s5255_s13 }
 0x10c   :  { %v596_v38 = vsel %vm71_vm1, %v589_v34, %v594_v33 }
 0x10d   :  { %p5262_p4 = por %p5261_p3, %p5260_p2 }
 0x10f   :  { %v558_v43 = vpop.f32.mrf.mxu1  ;;  %p5263_p5 = pnand %p5262_p4, %p5256_p1 }
 0x110   :  { %v559_v44 = vadd.f32 %v558_v43, %v484_v41 }
 0x111   :  { %v4665_v45 = vpop.f32.mrf.mxu1 }
 0x112   :  { %v562_v46 = vadd.f32 %v559_v44, %v72_v42 }
 0x114   :  { %5139 = vtanh.f32 %v562_v46  ;;  %v4338_v48 = vmul.f32 -1.442695, %v562_v46 }
 0x116   :  { %5141 = vpow2.f32 %v4338_v48 }
 0x121   :  { %v5140_v47 = vpop.eup %5139 }
 0x122   :  { %572 = vrot.lane.b32.xlu0 %v5140_v47, %s5290_s7 }
 0x123   :  { %v5142_v49 = vpop.eup %5141 }
 0x124   :  { %v566_v50 = vadd.f32 1.0, %v5142_v49 }
 0x126   :  { %5143 = vrcp.f32 %v566_v50 }
 0x133   :  { %v5144_v51 = vpop.eup %5143 }
 0x134   :  { %v570_v54 = vmul.f32 0.0, %v5144_v51 }
 0x194   :  { %v573_v52 = vpop.permute.xlu0 %572 }
 0x195   :  { %v575_v53 = vmul.f32 %v5144_v51, %v573_v52 }
 0x197   :  { %577 = vrot.lane.b32.xlu0 %v575_v53, %s5290_s7 }
 0x209   :  { %v578_v55 = vpop.permute.xlu0 %577 }
 0x20a   :  { %v5467_v56 = vadd.f32 %v578_v55, %v570_v54 }
 0x20c   :  { %5145 = vtanh.f32 %v5467_v56 }
 0x219   :  { %v5146_v57 = vpop.eup %5145 }
 0x21a   :  { %583 = vrot.lane.b32.xlu1 %v5146_v57, %s5290_s7 }
 0x28c   :  { %v584_v58 = vpop.permute.xlu1 %583 }
 0x28d   :  { %v5471_v59 = vmul.f32 %v5144_v51, %v584_v58 }
 0x28f   :  { %598 = vrot.lane.b32.xlu1 %v5471_v59, %s5291_s8 }
 0x301   :  { %v599_v60 = vpop.permute.xlu1 %598 }
 0x302   :  { %v600_v61 = vsel %vm73_vm2, %v599_v60, 0 }
 0x303   :  { %v671_v62 = vand.u32 4294901760, %v600_v61 }
 0x305   :  { %v672_v63 = vsub.f32 %v600_v61, %v671_v62  ;;  %4686 = vmatmul.mubr.f32.vlgmr.msra.gmra.mxu1 %v671_v62 }
 0x306   :  { %4700 = vmatpush3.msra.mxu1 %v5329_v4  ;;  %4707 = vmatprep.mubr.msk.f32.mxu1 %vm5289_vm0, %v5288_v3 }
 0x307   :  { %v673_v0 = vand.u32 4294901760, %v672_v63  ;;  %4701 = vmatprep.subr.mxu1 %v5288_v3 }
 0x308   :  { %4702 = vmatpush3.msra.mxu1 %v5331_v5 }
 0x309   :  { %v674_v1 = vsub.f32 %v672_v63, %v673_v0  ;;  %4703 = vmatprep.subr.mxu1 %v5288_v3 }
 0x30a   :  { %4704 = vmatpush3.msra.mxu1 %v5333_v6 }
 0x30b   :  { %v675_v2 = vand.u32 4294901760, %v674_v1  ;;  %4705 = vmatprep.subr.mxu1 %v5288_v3 }
 0x30c   :  { %4706 = vmatpush3.msra.mxu1 %v5336_v8 }
 0x30d   :  { %4708 = vmatmul.mubr.f32.vlgmr.msra.gmra.mxu1 %v673_v0  ;;  %4721 = vmatprep.subr.mxu1 %v5288_v3 }
 0x30e   :  { %4675 = vmatmul.mubr.f32.vlgmr.msra.gmra.mxu0 %v675_v2  ;;  %4722 = vmatpush3.msra.mxu1 %v5329_v4 }
 0x30f   :  { %4689 = vmatpush3.msra.mxu0 %v5344_v9  ;;  %4723 = vmatprep.subr.mxu1 %v5288_v3 }
 0x310   :  { %4690 = vmatprep.subr.mxu0 %v5288_v3  ;;  %4724 = vmatpush3.msra.mxu1 %v5331_v5 }
 0x311   :  { %4691 = vmatpush3.msra.mxu0 %v5347_v10  ;;  %4725 = vmatprep.subr.mxu1 %v5288_v3 }
 0x312   :  { %4692 = vmatprep.subr.mxu0 %v5288_v3  ;;  %4726 = vmatpush3.msra.mxu1 %v5333_v6 }
 0x313   :  { %4693 = vmatpush3.msra.mxu0 %v5350_v11  ;;  %4727 = vmatprep.subr.mxu1 %v5288_v3 }
 0x314   :  { %4694 = vmatprep.subr.mxu0 %v5288_v3  ;;  %4696 = vmatprep.mubr.msk.f32.mxu0 %vm5289_vm0, %v5288_v3 }
 0x315   :  { %4695 = vmatpush3.msra.mxu0 %v5354_v12  ;;  %4728 = vmatpush3.msra.mxu1 %v5336_v8 }
 0x316   :  { %4729 = vmatprep.mubr.msk.f32.mxu1 %vm5289_vm0, %v5288_v3  ;;  %4697 = vmatmul.mubr.f32.vlgmr.msra.gmra.mxu0 %v672_v63 }
 0x317   :  { %4710 = vmatprep.subr.mxu0 %v5288_v3  ;;  %4730 = vmatmul.mubr.f32.vlgmr.msra.gmra.mxu1 %v671_v62 }
 0x318   :  { %4711 = vmatpush3.msra.mxu0 %v5358_v13  ;;  %4718 = vmatprep.mubr.msk.f32.mxu0 %vm5289_vm0, %v5288_v3 }
 0x319   :  { %4712 = vmatprep.subr.mxu0 %v5288_v3  ;;  %4743 = vmatprep.subr.mxu1 %v5288_v3 }
 0x31a   :  { %4713 = vmatpush3.msra.mxu0 %v5361_v14  ;;  %4744 = vmatpush3.msra.mxu1 %v5379_v20 }
 0x31b   :  { %4714 = vmatprep.subr.mxu0 %v5288_v3  ;;  %4745 = vmatprep.subr.mxu1 %v5288_v3 }
 0x31c   :  { %4715 = vmatpush3.msra.mxu0 %v5364_v15  ;;  %4746 = vmatpush3.msra.mxu1 %v5381_v21 }
 0x31d   :  { %4716 = vmatprep.subr.mxu0 %v5288_v3  ;;  %4747 = vmatprep.subr.mxu1 %v5288_v3 }
 0x31e   :  { %4717 = vmatpush3.msra.mxu0 %v5368_v16  ;;  %4748 = vmatpush3.msra.mxu1 %v5389_v23 }
 0x31f   :  { %4719 = vmatmul.mubr.f32.vlgmr.msra.gmra.mxu0 %v671_v62  ;;  %4749 = vmatprep.subr.mxu1 %v5288_v3 }
 0x320   :  { %4750 = vmatpush3.msra.mxu1 %v5395_v24  ;;  %4732 = vmatprep.subr.mxu0 %v5288_v3 }
 0x321   :  { %4751 = vmatprep.mubr.msk.f32.mxu1 %vm5289_vm0, %v5288_v3  ;;  %4765 = vmatprep.subr.mxu1 %v5288_v3 }
 0x322   :  { %4733 = vmatpush3.msra.mxu0 %v5329_v4  ;;  %4740 = vmatprep.mubr.msk.f32.mxu0 %vm5289_vm0, %v5288_v3 }
 0x323   :  { %4734 = vmatprep.subr.mxu0 %v5288_v3 }
 0x324   :  { %4735 = vmatpush3.msra.mxu0 %v5331_v5 }
 0x325   :  { %4736 = vmatprep.subr.mxu0 %v5288_v3 }
 0x326   :  { %4737 = vmatpush3.msra.mxu0 %v5333_v6 }
 0x327   :  { %4738 = vmatprep.subr.mxu0 %v5288_v3 }
 0x328   :  { %4739 = vmatpush3.msra.mxu0 %v5336_v8 }
 0x329   :  { %4754 = vmatprep.subr.mxu0 %v5288_v3 }
 0x3c5   :  { %v768_v7 = vpop.f32.mrf.mxu1 }
 0x3c7   :  { %v4687_v17 = vpop.f32.mrf.mxu1 }
 0x3cd   :  { %v925_v18 = vpop.f32.mrf.mxu1 }
 0x3ce   :  { %v677_v19 = vpop.f32.mrf.mxu0 }
 0x3cf   :  { %v4709_v22 = vpop.f32.mrf.mxu1  ;;  %v769_v28 = vadd.f32 %v768_v7, %v677_v19 }
 0x3d0   :  { %v4676_v25 = vpop.f32.mrf.mxu0 }
 0x3d6   :  { %v848_v26 = vpop.f32.mrf.mxu0 }
 0x3d7   :  { %v1083_v27 = vpop.f32.mrf.mxu1  ;;  %v849_v31 = vadd.f32 %v848_v26, %v769_v28  ;;  %v1117_v28 = vld [vmem:[%s1116_s15] sm:$0x1] }
 0x3d8   :  { %v4698_v29 = vpop.f32.mrf.mxu0 }
 0x3d9   :  { %v4731_v30 = vpop.f32.mrf.mxu1  ;;  %v926_v35 = vadd.f32 %v925_v18, %v849_v31  ;;  %v1119_v29 = vrot.slane %v1117_v28, 7 }
 0x3da   :  { %v1114_v30 = vld [vmem:[%s1113_s16] sm:$0x1] }
 0x3db   :  { %v1121_v34 = vsel %vm71_vm1, %v1114_v30, %v1119_v29  ;;  %v1639_v29 = vld [vmem:[%s1638_s20] sm:$0x1] }
 0x3df   :  { %v1008_v36 = vpop.f32.mrf.mxu0 }
 0x3e0   :  { %v1009_v37 = vadd.f32 %v1008_v36, %v926_v35 }
 0x3e1   :  { %v4720_v39 = vpop.f32.mrf.mxu0 }
 0x3e2   :  { %v1084_v40 = vadd.f32 %v1083_v27, %v1009_v37 }
 0x3e4   :  { %v1087_v41 = vadd.f32 %v1084_v40, %v596_v38 }
 0x3e6   :  { %5147 = vtanh.f32 %v1087_v41  ;;  %v4341_v43 = vmul.f32 -1.442695, %v1087_v41 }
 0x3e8   :  { %5149 = vpow2.f32 %v4341_v43 }
 0x3f3   :  { %v5148_v42 = vpop.eup %5147 }
 0x3f4   :  { %1097 = vrot.lane.b32.xlu0 %v5148_v42, %s5290_s7 }
 0x3f5   :  { %v5150_v44 = vpop.eup %5149 }
 0x3f6   :  { %v1091_v45 = vadd.f32 1.0, %v5150_v44 }
 0x3f8   :  { %5151 = vrcp.f32 %v1091_v45 }
 0x405   :  { %v5152_v46 = vpop.eup %5151 }
 0x406   :  { %v1095_v49 = vmul.f32 %v5152_v46, %v5467_v56 }
 0x466   :  { %v1098_v47 = vpop.permute.xlu0 %1097 }
 0x467   :  { %v1100_v48 = vmul.f32 %v5152_v46, %v1098_v47 }
 0x469   :  { %1102 = vrot.lane.b32.xlu1 %v1100_v48, %s5290_s7 }
 0x4db   :  { %v1103_v50 = vpop.permute.xlu1 %1102 }
 0x4dc   :  { %v5540_v51 = vadd.f32 %v1103_v50, %v1095_v49 }
 0x4de   :  { %5153 = vtanh.f32 %v5540_v51 }
 0x4eb   :  { %v5154_v52 = vpop.eup %5153 }
 0x4ec   :  { %1108 = vrot.lane.b32.xlu0 %v5154_v52, %s5290_s7 }
 0x55e   :  { %v1109_v53 = vpop.permute.xlu0 %1108 }
 0x55f   :  { %v5544_v54 = vmul.f32 %v5152_v46, %v1109_v53 }
 0x561   :  { %1123 = vrot.lane.b32.xlu1 %v5544_v54, %s5291_s8  ;;  %v4262_v49 = vrot.slane %v5544_v54, 6 }
 0x5d3   :  { %v1124_v55 = vpop.permute.xlu1 %1123 }
 0x5d4   :  { %v1125_v57 = vsel %vm73_vm2, %v1124_v55, 0 }
 0x5d5   :  { %v1196_v58 = vand.u32 4294901760, %v1125_v57 }
 0x5d7   :  { %v1197_v60 = vsub.f32 %v1125_v57, %v1196_v58  ;;  %4752 = vmatmul.mubr.f32.vlgmr.msra.gmra.mxu1 %v1196_v58 }
 0x5d8   :  { %4766 = vmatpush3.msra.mxu1 %v5329_v4  ;;  %4773 = vmatprep.mubr.msk.f32.mxu1 %vm5289_vm0, %v5288_v3 }
 0x5d9   :  { %v1198_v56 = vand.u32 4294901760, %v1197_v60  ;;  %4767 = vmatprep.subr.mxu1 %v5288_v3 }
 0x5da   :  { %4768 = vmatpush3.msra.mxu1 %v5331_v5 }
 0x5db   :  { %v1199_v61 = vsub.f32 %v1197_v60, %v1198_v56  ;;  %4769 = vmatprep.subr.mxu1 %v5288_v3 }
 0x5dc   :  { %4770 = vmatpush3.msra.mxu1 %v5333_v6 }
 0x5dd   :  { %v1200_v62 = vand.u32 4294901760, %v1199_v61  ;;  %4771 = vmatprep.subr.mxu1 %v5288_v3 }
 0x5de   :  { %4772 = vmatpush3.msra.mxu1 %v5336_v8 }
 0x5df   :  { %4774 = vmatmul.mubr.f32.vlgmr.msra.gmra.mxu1 %v1198_v56  ;;  %4787 = vmatprep.subr.mxu1 %v5288_v3 }
 0x5e0   :  { %4741 = vmatmul.mubr.f32.vlgmr.msra.gmra.mxu0 %v1200_v62  ;;  %4788 = vmatpush3.msra.mxu1 %v5329_v4 }
 0x5e1   :  { %4755 = vmatpush3.msra.mxu0 %v5344_v9  ;;  %4789 = vmatprep.subr.mxu1 %v5288_v3 }
 0x5e2   :  { %4756 = vmatprep.subr.mxu0 %v5288_v3  ;;  %4790 = vmatpush3.msra.mxu1 %v5331_v5 }
 0x5e3   :  { %4757 = vmatpush3.msra.mxu0 %v5347_v10  ;;  %4791 = vmatprep.subr.mxu1 %v5288_v3 }
 0x5e4   :  { %4758 = vmatprep.subr.mxu0 %v5288_v3  ;;  %4792 = vmatpush3.msra.mxu1 %v5333_v6 }
 0x5e5   :  { %4759 = vmatpush3.msra.mxu0 %v5350_v11  ;;  %4793 = vmatprep.subr.mxu1 %v5288_v3 }
 0x5e6   :  { %4760 = vmatprep.subr.mxu0 %v5288_v3  ;;  %4762 = vmatprep.mubr.msk.f32.mxu0 %vm5289_vm0, %v5288_v3 }
 0x5e7   :  { %4761 = vmatpush3.msra.mxu0 %v5354_v12  ;;  %4794 = vmatpush3.msra.mxu1 %v5336_v8 }
 0x5e8   :  { %4795 = vmatprep.mubr.msk.f32.mxu1 %vm5289_vm0, %v5288_v3  ;;  %4763 = vmatmul.mubr.f32.vlgmr.msra.gmra.mxu0 %v1197_v60 }
 0x5e9   :  { %4776 = vmatprep.subr.mxu0 %v5288_v3  ;;  %4796 = vmatmul.mubr.f32.vlgmr.msra.gmra.mxu1 %v1196_v58 }
 0x5ea   :  { %4777 = vmatpush3.msra.mxu0 %v5358_v13  ;;  %4784 = vmatprep.mubr.msk.f32.mxu0 %vm5289_vm0, %v5288_v3 }
 0x5eb   :  { %4778 = vmatprep.subr.mxu0 %v5288_v3  ;;  %4809 = vmatprep.subr.mxu1 %v5288_v3 }
 0x5ec   :  { %4779 = vmatpush3.msra.mxu0 %v5361_v14  ;;  %4810 = vmatpush3.msra.mxu1 %v5379_v20 }
 0x5ed   :  { %4780 = vmatprep.subr.mxu0 %v5288_v3  ;;  %4811 = vmatprep.subr.mxu1 %v5288_v3 }
 0x5ee   :  { %4781 = vmatpush3.msra.mxu0 %v5364_v15  ;;  %4812 = vmatpush3.msra.mxu1 %v5381_v21 }
 0x5ef   :  { %4782 = vmatprep.subr.mxu0 %v5288_v3  ;;  %4813 = vmatprep.subr.mxu1 %v5288_v3 }
 0x5f0   :  { %4783 = vmatpush3.msra.mxu0 %v5368_v16  ;;  %4814 = vmatpush3.msra.mxu1 %v5389_v23 }
 0x5f1   :  { %4785 = vmatmul.mubr.f32.vlgmr.msra.gmra.mxu0 %v1196_v58  ;;  %4815 = vmatprep.subr.mxu1 %v5288_v3 }
 0x5f2   :  { %4816 = vmatpush3.msra.mxu1 %v5395_v24  ;;  %4798 = vmatprep.subr.mxu0 %v5288_v3 }
 0x5f3   :  { %4817 = vmatprep.mubr.msk.f32.mxu1 %vm5289_vm0, %v5288_v3  ;;  %4831 = vmatprep.subr.mxu1 %v5288_v3 }
 0x5f4   :  { %4799 = vmatpush3.msra.mxu0 %v5329_v4  ;;  %4806 = vmatprep.mubr.msk.f32.mxu0 %vm5289_vm0, %v5288_v3 }
 0x5f5   :  { %4800 = vmatprep.subr.mxu0 %v5288_v3 }
 0x5f6   :  { %4801 = vmatpush3.msra.mxu0 %v5331_v5 }
 0x5f7   :  { %4802 = vmatprep.subr.mxu0 %v5288_v3 }
 0x5f8   :  { %4803 = vmatpush3.msra.mxu0 %v5333_v6 }
 0x5f9   :  { %4804 = vmatprep.subr.mxu0 %v5288_v3 }
 0x5fa   :  { %4805 = vmatpush3.msra.mxu0 %v5336_v8 }
 0x5fb   :  { %4820 = vmatprep.subr.mxu0 %v5288_v3 }
 0x697   :  { %v1293_v63 = vpop.f32.mrf.mxu1 }
 0x699   :  { %v4753_v0 = vpop.f32.mrf.mxu1 }
 0x69f   :  { %v1450_v1 = vpop.f32.mrf.mxu1 }
 0x6a0   :  { %v1202_v2 = vpop.f32.mrf.mxu0 }
 0x6a1   :  { %v4775_v7 = vpop.f32.mrf.mxu1  ;;  %v1294_v22 = vadd.f32 %v1293_v63, %v1202_v2 }
 0x6a2   :  { %v4742_v17 = vpop.f32.mrf.mxu0 }
 0x6a8   :  { %v1373_v18 = vpop.f32.mrf.mxu0 }
 0x6a9   :  { %v1608_v19 = vpop.f32.mrf.mxu1  ;;  %v1374_v27 = vadd.f32 %v1373_v18, %v1294_v22 }
 0x6aa   :  { %v4764_v25 = vpop.f32.mrf.mxu0 }
 0x6ab   :  { %v4797_v26 = vpop.f32.mrf.mxu1  ;;  %v1451_v31 = vadd.f32 %v1450_v1, %v1374_v27  ;;  %v1642_v27 = vld [vmem:[%s1641_s19] sm:$0x1] }
 0x6ac   :  { %v1644_v28 = vrot.slane %v1642_v27, 7 }
 0x6b1   :  { %v1533_v32 = vpop.f32.mrf.mxu0 }
 0x6b2   :  { %v1534_v33 = vadd.f32 %v1533_v32, %v1451_v31 }
 0x6b3   :  { %v4786_v35 = vpop.f32.mrf.mxu0 }
 0x6b4   :  { %v1609_v36 = vadd.f32 %v1608_v19, %v1534_v33  ;;  %v1646_v33 = vsel %vm71_vm1, %v1639_v29, %v1644_v28 }
 0x6b6   :  { %v1612_v37 = vadd.f32 %v1609_v36, %v1121_v34 }
 0x6b8   :  { %5155 = vtanh.f32 %v1612_v37  ;;  %v4344_v39 = vmul.f32 -1.442695, %v1612_v37 }
 0x6ba   :  { %5157 = vpow2.f32 %v4344_v39 }
 0x6c5   :  { %v5156_v38 = vpop.eup %5155 }
 0x6c6   :  { %1622 = vrot.lane.b32.xlu0 %v5156_v38, %s5290_s7 }
 0x6c7   :  { %v5158_v40 = vpop.eup %5157 }
 0x6c8   :  { %v1616_v41 = vadd.f32 1.0, %v5158_v40 }
 0x6ca   :  { %5159 = vrcp.f32 %v1616_v41 }
 0x6d7   :  { %v5160_v42 = vpop.eup %5159 }
 0x6d8   :  { %v1620_v45 = vmul.f32 %v5160_v42, %v5540_v51  ;;  %v4276_v51 = vsel %vm4275_vm3, %v5471_v59, %v4262_v49 }
 0x738   :  { %v1623_v43 = vpop.permute.xlu0 %1622 }
 0x739   :  { %v1625_v44 = vmul.f32 %v5160_v42, %v1623_v43 }
 0x73b   :  { %1627 = vrot.lane.b32.xlu1 %v1625_v44, %s5290_s7 }
 0x7ad   :  { %v1628_v46 = vpop.permute.xlu1 %1627 }
 0x7ae   :  { %v5613_v47 = vadd.f32 %v1628_v46, %v1620_v45 }
 0x7b0   :  { %5161 = vtanh.f32 %v5613_v47 }
 0x7bd   :  { %v5162_v48 = vpop.eup %5161 }
 0x7be   :  { %1633 = vrot.lane.b32.xlu0 %v5162_v48, %s5290_s7 }
 0x830   :  { %v1634_v50 = vpop.permute.xlu0 %1633 }
 0x831   :  { %v1636_v52 = vmul.f32 %v5160_v42, %v1634_v50 }
 0x833   :  { %v4264_v53 = vrot.slane %v1636_v52, 4  ;;  %1648 = vrot.lane.b32.xlu1 %v1636_v52, %s5291_s8 }
 0x835   :  { %v5622_v55 = vsel %vm4277_vm4, %v4276_v51, %v4264_v53 }
 0x8a5   :  { %v1649_v57 = vpop.permute.xlu1 %1648 }
 0x8a6   :  { %v1650_v58 = vsel %vm73_vm2, %v1649_v57, 0 }
 0x8a7   :  { %v1721_v60 = vand.u32 4294901760, %v1650_v58 }
 0x8a9   :  { %v1722_v56 = vsub.f32 %v1650_v58, %v1721_v60  ;;  %4818 = vmatmul.mubr.f32.vlgmr.msra.gmra.mxu1 %v1721_v60 }
 0x8aa   :  { %4832 = vmatpush3.msra.mxu1 %v5329_v4  ;;  %4839 = vmatprep.mubr.msk.f32.mxu1 %vm5289_vm0, %v5288_v3 }
 0x8ab   :  { %v1723_v54 = vand.u32 4294901760, %v1722_v56  ;;  %4833 = vmatprep.subr.mxu1 %v5288_v3 }
 0x8ac   :  { %4834 = vmatpush3.msra.mxu1 %v5331_v5 }
 0x8ad   :  { %v1724_v59 = vsub.f32 %v1722_v56, %v1723_v54  ;;  %4835 = vmatprep.subr.mxu1 %v5288_v3 }
 0x8ae   :  { %4836 = vmatpush3.msra.mxu1 %v5333_v6 }
 0x8af   :  { %v1725_v61 = vand.u32 4294901760, %v1724_v59  ;;  %4837 = vmatprep.subr.mxu1 %v5288_v3 }
 0x8b0   :  { %4838 = vmatpush3.msra.mxu1 %v5336_v8 }
 0x8b1   :  { %4840 = vmatmul.mubr.f32.vlgmr.msra.gmra.mxu1 %v1723_v54  ;;  %4853 = vmatprep.subr.mxu1 %v5288_v3 }
 0x8b2   :  { %4807 = vmatmul.mubr.f32.vlgmr.msra.gmra.mxu0 %v1725_v61  ;;  %4854 = vmatpush3.msra.mxu1 %v5329_v4 }
 0x8b3   :  { %4821 = vmatpush3.msra.mxu0 %v5344_v9  ;;  %4855 = vmatprep.subr.mxu1 %v5288_v3 }
 0x8b4   :  { %4822 = vmatprep.subr.mxu0 %v5288_v3  ;;  %4856 = vmatpush3.msra.mxu1 %v5331_v5 }
 0x8b5   :  { %4823 = vmatpush3.msra.mxu0 %v5347_v10  ;;  %4857 = vmatprep.subr.mxu1 %v5288_v3 }
 0x8b6   :  { %4824 = vmatprep.subr.mxu0 %v5288_v3  ;;  %4858 = vmatpush3.msra.mxu1 %v5333_v6 }
 0x8b7   :  { %4825 = vmatpush3.msra.mxu0 %v5350_v11  ;;  %4859 = vmatprep.subr.mxu1 %v5288_v3 }
 0x8b8   :  { %4826 = vmatprep.subr.mxu0 %v5288_v3  ;;  %4828 = vmatprep.mubr.msk.f32.mxu0 %vm5289_vm0, %v5288_v3 }
 0x8b9   :  { %4827 = vmatpush3.msra.mxu0 %v5354_v12  ;;  %4860 = vmatpush3.msra.mxu1 %v5336_v8 }
 0x8ba   :  { %4861 = vmatprep.mubr.msk.f32.mxu1 %vm5289_vm0, %v5288_v3  ;;  %4829 = vmatmul.mubr.f32.vlgmr.msra.gmra.mxu0 %v1722_v56 }
 0x8bb   :  { %4842 = vmatprep.subr.mxu0 %v5288_v3  ;;  %4862 = vmatmul.mubr.f32.vlgmr.msra.gmra.mxu1 %v1721_v60 }
 0x8bc   :  { %4843 = vmatpush3.msra.mxu0 %v5358_v13  ;;  %4850 = vmatprep.mubr.msk.f32.mxu0 %vm5289_vm0, %v5288_v3 }
 0x8bd   :  { %4844 = vmatprep.subr.mxu0 %v5288_v3  ;;  %4875 = vmatprep.subr.mxu1 %v5288_v3 }
 0x8be   :  { %4845 = vmatpush3.msra.mxu0 %v5361_v14  ;;  %4876 = vmatpush3.msra.mxu1 %v5379_v20 }
 0x8bf   :  { %4846 = vmatprep.subr.mxu0 %v5288_v3  ;;  %4877 = vmatprep.subr.mxu1 %v5288_v3 }
 0x8c0   :  { %4847 = vmatpush3.msra.mxu0 %v5364_v15  ;;  %4878 = vmatpush3.msra.mxu1 %v5381_v21 }
 0x8c1   :  { %4848 = vmatprep.subr.mxu0 %v5288_v3  ;;  %4879 = vmatprep.subr.mxu1 %v5288_v3 }
 0x8c2   :  { %4849 = vmatpush3.msra.mxu0 %v5368_v16  ;;  %4880 = vmatpush3.msra.mxu1 %v5389_v23 }
 0x8c3   :  { %4851 = vmatmul.mubr.f32.vlgmr.msra.gmra.mxu0 %v1721_v60  ;;  %4881 = vmatprep.subr.mxu1 %v5288_v3 }
 0x8c4   :  { %4882 = vmatpush3.msra.mxu1 %v5395_v24  ;;  %4864 = vmatprep.subr.mxu0 %v5288_v3 }
 0x8c5   :  { %4883 = vmatprep.mubr.msk.f32.mxu1 %vm5289_vm0, %v5288_v3  ;;  %4897 = vmatprep.subr.mxu1 %v5288_v3 }
 0x8c6   :  { %4865 = vmatpush3.msra.mxu0 %v5329_v4  ;;  %4872 = vmatprep.mubr.msk.f32.mxu0 %vm5289_vm0, %v5288_v3 }
 0x8c7   :  { %4866 = vmatprep.subr.mxu0 %v5288_v3 }
 0x8c8   :  { %4867 = vmatpush3.msra.mxu0 %v5331_v5 }
 0x8c9   :  { %4868 = vmatprep.subr.mxu0 %v5288_v3 }
 0x8ca   :  { %4869 = vmatpush3.msra.mxu0 %v5333_v6 }
 0x8cb   :  { %4870 = vmatprep.subr.mxu0 %v5288_v3 }
 0x8cc   :  { %4871 = vmatpush3.msra.mxu0 %v5336_v8 }
 0x8cd   :  { %4886 = vmatprep.subr.mxu0 %v5288_v3 }
 0x969   :  { %v1818_v62 = vpop.f32.mrf.mxu1 }
 0x96b   :  { %v4819_v63 = vpop.f32.mrf.mxu1 }
 0x971   :  { %v1975_v0 = vpop.f32.mrf.mxu1 }
 0x972   :  { %v1727_v1 = vpop.f32.mrf.mxu0 }
 0x973   :  { %v4841_v2 = vpop.f32.mrf.mxu1  ;;  %v1819_v19 = vadd.f32 %v1818_v62, %v1727_v1 }
 0x974   :  { %v4808_v7 = vpop.f32.mrf.mxu0 }
 0x97a   :  { %v1898_v17 = vpop.f32.mrf.mxu0 }
 0x97b   :  { %v2133_v18 = vpop.f32.mrf.mxu1  ;;  %v1899_v26 = vadd.f32 %v1898_v17, %v1819_v19 }
 0x97c   :  { %v4830_v22 = vpop.f32.mrf.mxu0 }
 0x97d   :  { %v4863_v25 = vpop.f32.mrf.mxu1  ;;  %v1976_v30 = vadd.f32 %v1975_v0, %v1899_v26  ;;  %v2167_v22 = vld [vmem:[%s2166_s0] sm:$0x1] }
 0x97e   :  { %v2169_v25 = vrot.slane %v2167_v22, 7  ;;  %v2164_v26 = vld [vmem:[%s2163_s23] sm:$0x1] }
 0x983   :  { %v2058_v31 = vpop.f32.mrf.mxu0 }
 0x984   :  { %v2059_v32 = vadd.f32 %v2058_v31, %v1976_v30  ;;  %v2171_v30 = vsel %vm71_vm1, %v2164_v26, %v2169_v25 }
 0x985   :  { %v4852_v34 = vpop.f32.mrf.mxu0 }
 0x986   :  { %v2134_v35 = vadd.f32 %v2133_v18, %v2059_v32 }
 0x988   :  { %v2137_v36 = vadd.f32 %v2134_v35, %v1646_v33 }
 0x98a   :  { %5163 = vtanh.f32 %v2137_v36  ;;  %v4347_v38 = vmul.f32 -1.442695, %v2137_v36 }
 0x98c   :  { %5165 = vpow2.f32 %v4347_v38 }
 0x997   :  { %v5164_v37 = vpop.eup %5163 }
 0x998   :  { %2147 = vrot.lane.b32.xlu0 %v5164_v37, %s5290_s7 }
 0x999   :  { %v5166_v39 = vpop.eup %5165 }
 0x99a   :  { %v2141_v40 = vadd.f32 1.0, %v5166_v39 }
 0x99c   :  { %5167 = vrcp.f32 %v2141_v40 }
 0x9a9   :  { %v5168_v41 = vpop.eup %5167 }
 0x9aa   :  { %v2145_v44 = vmul.f32 %v5168_v41, %v5613_v47 }
 0xa0a   :  { %v2148_v42 = vpop.permute.xlu0 %2147 }
 0xa0b   :  { %v2150_v43 = vmul.f32 %v5168_v41, %v2148_v42 }
 0xa0d   :  { %2152 = vrot.lane.b32.xlu1 %v2150_v43, %s5290_s7 }
 0xa7f   :  { %v2153_v45 = vpop.permute.xlu1 %2152 }
 0xa80   :  { %v5689_v46 = vadd.f32 %v2153_v45, %v2145_v44 }
 0xa82   :  { %5169 = vtanh.f32 %v5689_v46 }
 0xa8f   :  { %v5170_v48 = vpop.eup %5169 }
 0xa90   :  { %2158 = vrot.lane.b32.xlu0 %v5170_v48, %s5290_s7 }
 0xb02   :  { %v2159_v49 = vpop.permute.xlu0 %2158 }
 0xb03   :  { %v2161_v50 = vmul.f32 %v5168_v41, %v2159_v49 }
 0xb05   :  { %v4266_v52 = vrot.slane %v2161_v50, 2  ;;  %2173 = vrot.lane.b32.xlu1 %v2161_v50, %s5291_s8 }
 0xb07   :  { %v5696_v53 = vsel %vm4279_vm5, %v5622_v55, %v4266_v52 }
 0xb77   :  { %v2174_v51 = vpop.permute.xlu1 %2173 }
 0xb78   :  { %v2175_v47 = vsel %vm73_vm2, %v2174_v51, 0 }
 0xb79   :  { %v2246_v57 = vand.u32 4294901760, %v2175_v47 }
 0xb7b   :  { %v2247_v58 = vsub.f32 %v2175_v47, %v2246_v57  ;;  %4884 = vmatmul.mubr.f32.vlgmr.msra.gmra.mxu1 %v2246_v57 }
 0xb7c   :  { %4898 = vmatpush3.msra.mxu1 %v5329_v4  ;;  %4905 = vmatprep.mubr.msk.f32.mxu1 %vm5289_vm0, %v5288_v3 }
 0xb7d   :  { %v2248_v60 = vand.u32 4294901760, %v2247_v58  ;;  %4899 = vmatprep.subr.mxu1 %v5288_v3 }
 0xb7e   :  { %4900 = vmatpush3.msra.mxu1 %v5331_v5 }
 0xb7f   :  { %v2249_v56 = vsub.f32 %v2247_v58, %v2248_v60  ;;  %4901 = vmatprep.subr.mxu1 %v5288_v3 }
 0xb80   :  { %4902 = vmatpush3.msra.mxu1 %v5333_v6 }
 0xb81   :  { %v2250_v55 = vand.u32 4294901760, %v2249_v56  ;;  %4903 = vmatprep.subr.mxu1 %v5288_v3 }
 0xb82   :  { %4904 = vmatpush3.msra.mxu1 %v5336_v8 }
 0xb83   :  { %4906 = vmatmul.mubr.f32.vlgmr.msra.gmra.mxu1 %v2248_v60  ;;  %4919 = vmatprep.subr.mxu1 %v5288_v3 }
 0xb84   :  { %4873 = vmatmul.mubr.f32.vlgmr.msra.gmra.mxu0 %v2250_v55  ;;  %4920 = vmatpush3.msra.mxu1 %v5329_v4 }
 0xb85   :  { %4887 = vmatpush3.msra.mxu0 %v5344_v9  ;;  %4921 = vmatprep.subr.mxu1 %v5288_v3 }
 0xb86   :  { %4888 = vmatprep.subr.mxu0 %v5288_v3  ;;  %4922 = vmatpush3.msra.mxu1 %v5331_v5 }
 0xb87   :  { %4889 = vmatpush3.msra.mxu0 %v5347_v10  ;;  %4923 = vmatprep.subr.mxu1 %v5288_v3 }
 0xb88   :  { %4890 = vmatprep.subr.mxu0 %v5288_v3  ;;  %4924 = vmatpush3.msra.mxu1 %v5333_v6 }
 0xb89   :  { %4891 = vmatpush3.msra.mxu0 %v5350_v11  ;;  %4925 = vmatprep.subr.mxu1 %v5288_v3 }
 0xb8a   :  { %4892 = vmatprep.subr.mxu0 %v5288_v3  ;;  %4894 = vmatprep.mubr.msk.f32.mxu0 %vm5289_vm0, %v5288_v3 }
 0xb8b   :  { %4893 = vmatpush3.msra.mxu0 %v5354_v12  ;;  %4926 = vmatpush3.msra.mxu1 %v5336_v8 }
 0xb8c   :  { %4927 = vmatprep.mubr.msk.f32.mxu1 %vm5289_vm0, %v5288_v3  ;;  %4895 = vmatmul.mubr.f32.vlgmr.msra.gmra.mxu0 %v2247_v58 }
 0xb8d   :  { %4908 = vmatprep.subr.mxu0 %v5288_v3  ;;  %4928 = vmatmul.mubr.f32.vlgmr.msra.gmra.mxu1 %v2246_v57 }
 0xb8e   :  { %4909 = vmatpush3.msra.mxu0 %v5358_v13  ;;  %4916 = vmatprep.mubr.msk.f32.mxu0 %vm5289_vm0, %v5288_v3 }
 0xb8f   :  { %4910 = vmatprep.subr.mxu0 %v5288_v3  ;;  %4941 = vmatprep.subr.mxu1 %v5288_v3 }
 0xb90   :  { %4911 = vmatpush3.msra.mxu0 %v5361_v14  ;;  %4942 = vmatpush3.msra.mxu1 %v5379_v20 }
 0xb91   :  { %4912 = vmatprep.subr.mxu0 %v5288_v3  ;;  %4943 = vmatprep.subr.mxu1 %v5288_v3 }
 0xb92   :  { %4913 = vmatpush3.msra.mxu0 %v5364_v15  ;;  %4944 = vmatpush3.msra.mxu1 %v5381_v21 }
 0xb93   :  { %4914 = vmatprep.subr.mxu0 %v5288_v3  ;;  %4945 = vmatprep.subr.mxu1 %v5288_v3 }
 0xb94   :  { %4915 = vmatpush3.msra.mxu0 %v5368_v16  ;;  %4946 = vmatpush3.msra.mxu1 %v5389_v23 }
 0xb95   :  { %4917 = vmatmul.mubr.f32.vlgmr.msra.gmra.mxu0 %v2246_v57  ;;  %4947 = vmatprep.subr.mxu1 %v5288_v3 }
 0xb96   :  { %4948 = vmatpush3.msra.mxu1 %v5395_v24  ;;  %4930 = vmatprep.subr.mxu0 %v5288_v3 }
 0xb97   :  { %4949 = vmatprep.mubr.msk.f32.mxu1 %vm5289_vm0, %v5288_v3  ;;  %4963 = vmatprep.subr.mxu1 %v5288_v3 }
 0xb98   :  { %4931 = vmatpush3.msra.mxu0 %v5329_v4  ;;  %4938 = vmatprep.mubr.msk.f32.mxu0 %vm5289_vm0, %v5288_v3 }
 0xb99   :  { %4932 = vmatprep.subr.mxu0 %v5288_v3 }
 0xb9a   :  { %4933 = vmatpush3.msra.mxu0 %v5331_v5 }
 0xb9b   :  { %4934 = vmatprep.subr.mxu0 %v5288_v3 }
 0xb9c   :  { %4935 = vmatpush3.msra.mxu0 %v5333_v6 }
 0xb9d   :  { %4936 = vmatprep.subr.mxu0 %v5288_v3 }
 0xb9e   :  { %4937 = vmatpush3.msra.mxu0 %v5336_v8 }
 0xb9f   :  { %4952 = vmatprep.subr.mxu0 %v5288_v3 }
 0xc3b   :  { %v2343_v54 = vpop.f32.mrf.mxu1 }
 0xc3d   :  { %v4885_v59 = vpop.f32.mrf.mxu1 }
 0xc43   :  { %v2500_v61 = vpop.f32.mrf.mxu1 }
 0xc44   :  { %v2252_v62 = vpop.f32.mrf.mxu0 }
 0xc45   :  { %v4907_v63 = vpop.f32.mrf.mxu1  ;;  %v2344_v7 = vadd.f32 %v2343_v54, %v2252_v62 }
 0xc46   :  { %v4874_v0 = vpop.f32.mrf.mxu0 }
 0xc4c   :  { %v2423_v1 = vpop.f32.mrf.mxu0 }
 0xc4d   :  { %v2658_v2 = vpop.f32.mrf.mxu1  ;;  %v2424_v19 = vadd.f32 %v2423_v1, %v2344_v7  ;;  %v2692_v7 = vld [vmem:[%s2691_s26] sm:$0x1] }
 0xc4e   :  { %v4896_v17 = vpop.f32.mrf.mxu0 }
 0xc4f   :  { %v4929_v18 = vpop.f32.mrf.mxu1  ;;  %v2501_v27 = vadd.f32 %v2500_v61, %v2424_v19  ;;  %v2694_v17 = vrot.slane %v2692_v7, 7 }
 0xc50   :  { %v2689_v18 = vld [vmem:[%s2688_s27] sm:$0x1] }
 0xc51   :  { %v2696_v26 = vsel %vm71_vm1, %v2689_v18, %v2694_v17 }
 0xc55   :  { %v2583_v28 = vpop.f32.mrf.mxu0 }
 0xc56   :  { %v2584_v29 = vadd.f32 %v2583_v28, %v2501_v27 }
 0xc57   :  { %v4918_v31 = vpop.f32.mrf.mxu0 }
 0xc58   :  { %v2659_v32 = vadd.f32 %v2658_v2, %v2584_v29 }
 0xc5a   :  { %v2662_v33 = vadd.f32 %v2659_v32, %v2171_v30 }
 0xc5c   :  { %5171 = vtanh.f32 %v2662_v33  ;;  %v4350_v35 = vmul.f32 -1.442695, %v2662_v33 }
 0xc5e   :  { %5173 = vpow2.f32 %v4350_v35 }
 0xc69   :  { %v5172_v34 = vpop.eup %5171 }
 0xc6a   :  { %2672 = vrot.lane.b32.xlu0 %v5172_v34, %s5290_s7 }
 0xc6b   :  { %v5174_v36 = vpop.eup %5173 }
 0xc6c   :  { %v2666_v37 = vadd.f32 1.0, %v5174_v36 }
 0xc6e   :  { %5175 = vrcp.f32 %v2666_v37 }
 0xc7b   :  { %v5176_v38 = vpop.eup %5175 }
 0xc7c   :  { %v2670_v41 = vmul.f32 %v5176_v38, %v5689_v46 }
 0xcdc   :  { %v2673_v39 = vpop.permute.xlu0 %2672 }
 0xcdd   :  { %v2675_v40 = vmul.f32 %v5176_v38, %v2673_v39 }
 0xcdf   :  { %2677 = vrot.lane.b32.xlu1 %v2675_v40, %s5290_s7 }
 0xd51   :  { %v2678_v42 = vpop.permute.xlu1 %2677 }
 0xd52   :  { %v5763_v43 = vadd.f32 %v2678_v42, %v2670_v41 }
 0xd54   :  { %5177 = vtanh.f32 %v5763_v43 }
 0xd61   :  { %v5178_v44 = vpop.eup %5177 }
 0xd62   :  { %2683 = vrot.lane.b32.xlu0 %v5178_v44, %s5290_s7 }
 0xdd4   :  { %v2684_v45 = vpop.permute.xlu0 %2683 }
 0xdd5   :  { %v5767_v48 = vmul.f32 %v5176_v38, %v2684_v45 }
 0xdd7   :  { %2698 = vrot.lane.b32.xlu1 %v5767_v48, %s5291_s8 }
 0xe49   :  { %v2699_v49 = vpop.permute.xlu1 %2698 }
 0xe4a   :  { %v2700_v50 = vsel %vm73_vm2, %v2699_v49, 0 }
 0xe4b   :  { %v2771_v52 = vand.u32 4294901760, %v2700_v50 }
 0xe4d   :  { %v2772_v51 = vsub.f32 %v2700_v50, %v2771_v52  ;;  %4950 = vmatmul.mubr.f32.vlgmr.msra.gmra.mxu1 %v2771_v52 }
 0xe4e   :  { %4964 = vmatpush3.msra.mxu1 %v5329_v4  ;;  %4971 = vmatprep.mubr.msk.f32.mxu1 %vm5289_vm0, %v5288_v3 }
 0xe4f   :  { %v2773_v46 = vand.u32 4294901760, %v2772_v51  ;;  %4965 = vmatprep.subr.mxu1 %v5288_v3 }
 0xe50   :  { %4966 = vmatpush3.msra.mxu1 %v5331_v5 }
 0xe51   :  { %v2774_v47 = vsub.f32 %v2772_v51, %v2773_v46  ;;  %4967 = vmatprep.subr.mxu1 %v5288_v3 }
 0xe52   :  { %4968 = vmatpush3.msra.mxu1 %v5333_v6 }
 0xe53   :  { %v2775_v57 = vand.u32 4294901760, %v2774_v47  ;;  %4969 = vmatprep.subr.mxu1 %v5288_v3 }
 0xe54   :  { %4970 = vmatpush3.msra.mxu1 %v5336_v8 }
 0xe55   :  { %4972 = vmatmul.mubr.f32.vlgmr.msra.gmra.mxu1 %v2773_v46  ;;  %4985 = vmatprep.subr.mxu1 %v5288_v3 }
 0xe56   :  { %4939 = vmatmul.mubr.f32.vlgmr.msra.gmra.mxu0 %v2775_v57  ;;  %4986 = vmatpush3.msra.mxu1 %v5329_v4 }
 0xe57   :  { %4953 = vmatpush3.msra.mxu0 %v5344_v9  ;;  %4987 = vmatprep.subr.mxu1 %v5288_v3 }
 0xe58   :  { %4954 = vmatprep.subr.mxu0 %v5288_v3  ;;  %4988 = vmatpush3.msra.mxu1 %v5331_v5 }
 0xe59   :  { %4955 = vmatpush3.msra.mxu0 %v5347_v10  ;;  %4989 = vmatprep.subr.mxu1 %v5288_v3 }
 0xe5a   :  { %4956 = vmatprep.subr.mxu0 %v5288_v3  ;;  %4990 = vmatpush3.msra.mxu1 %v5333_v6 }
 0xe5b   :  { %4957 = vmatpush3.msra.mxu0 %v5350_v11  ;;  %4991 = vmatprep.subr.mxu1 %v5288_v3 }
 0xe5c   :  { %4958 = vmatprep.subr.mxu0 %v5288_v3  ;;  %4960 = vmatprep.mubr.msk.f32.mxu0 %vm5289_vm0, %v5288_v3 }
 0xe5d   :  { %4959 = vmatpush3.msra.mxu0 %v5354_v12  ;;  %4992 = vmatpush3.msra.mxu1 %v5336_v8 }
 0xe5e   :  { %4993 = vmatprep.mubr.msk.f32.mxu1 %vm5289_vm0, %v5288_v3  ;;  %4961 = vmatmul.mubr.f32.vlgmr.msra.gmra.mxu0 %v2772_v51 }
 0xe5f   :  { %4974 = vmatprep.subr.mxu0 %v5288_v3  ;;  %4994 = vmatmul.mubr.f32.vlgmr.msra.gmra.mxu1 %v2771_v52 }
 0xe60   :  { %4975 = vmatpush3.msra.mxu0 %v5358_v13  ;;  %4982 = vmatprep.mubr.msk.f32.mxu0 %vm5289_vm0, %v5288_v3 }
 0xe61   :  { %4976 = vmatprep.subr.mxu0 %v5288_v3  ;;  %5007 = vmatprep.subr.mxu1 %v5288_v3 }
 0xe62   :  { %4977 = vmatpush3.msra.mxu0 %v5361_v14  ;;  %5008 = vmatpush3.msra.mxu1 %v5379_v20 }
 0xe63   :  { %4978 = vmatprep.subr.mxu0 %v5288_v3  ;;  %5009 = vmatprep.subr.mxu1 %v5288_v3 }
 0xe64   :  { %4979 = vmatpush3.msra.mxu0 %v5364_v15  ;;  %5010 = vmatpush3.msra.mxu1 %v5381_v21 }
 0xe65   :  { %4980 = vmatprep.subr.mxu0 %v5288_v3  ;;  %5011 = vmatprep.subr.mxu1 %v5288_v3 }
 0xe66   :  { %4981 = vmatpush3.msra.mxu0 %v5368_v16  ;;  %5012 = vmatpush3.msra.mxu1 %v5389_v23 }
 0xe67   :  { %4983 = vmatmul.mubr.f32.vlgmr.msra.gmra.mxu0 %v2771_v52  ;;  %5013 = vmatprep.subr.mxu1 %v5288_v3 }
 0xe68   :  { %5014 = vmatpush3.msra.mxu1 %v5395_v24  ;;  %4996 = vmatprep.subr.mxu0 %v5288_v3 }
 0xe69   :  { %5015 = vmatprep.mubr.msk.f32.mxu1 %vm5289_vm0, %v5288_v3  ;;  %5029 = vmatprep.subr.mxu1 %v5288_v3 }
 0xe6a   :  { %4997 = vmatpush3.msra.mxu0 %v5329_v4  ;;  %5004 = vmatprep.mubr.msk.f32.mxu0 %vm5289_vm0, %v5288_v3 }
 0xe6b   :  { %4998 = vmatprep.subr.mxu0 %v5288_v3 }
 0xe6c   :  { %4999 = vmatpush3.msra.mxu0 %v5331_v5 }
 0xe6d   :  { %5000 = vmatprep.subr.mxu0 %v5288_v3 }
 0xe6e   :  { %5001 = vmatpush3.msra.mxu0 %v5333_v6 }
 0xe6f   :  { %5002 = vmatprep.subr.mxu0 %v5288_v3 }
 0xe70   :  { %5003 = vmatpush3.msra.mxu0 %v5336_v8 }
 0xe71   :  { %5018 = vmatprep.subr.mxu0 %v5288_v3 }
 0xf0d   :  { %v2868_v58 = vpop.f32.mrf.mxu1 }
 0xf0f   :  { %v4951_v60 = vpop.f32.mrf.mxu1 }
 0xf15   :  { %v3025_v56 = vpop.f32.mrf.mxu1 }
 0xf16   :  { %v2777_v55 = vpop.f32.mrf.mxu0 }
 0xf17   :  { %v4973_v54 = vpop.f32.mrf.mxu1  ;;  %v2869_v63 = vadd.f32 %v2868_v58, %v2777_v55 }
 0xf18   :  { %v4940_v59 = vpop.f32.mrf.mxu0 }
 0xf19   :  { %v3217_v59 = vld [vmem:[%s3216_s30] sm:$0x1] }
 0xf1e   :  { %v2948_v61 = vpop.f32.mrf.mxu0 }
 0xf1f   :  { %v3183_v62 = vpop.f32.mrf.mxu1  ;;  %v2949_v2 = vadd.f32 %v2948_v61, %v2869_v63  ;;  %v3219_v61 = vrot.slane %v3217_v59, 7 }
 0xf20   :  { %v4962_v0 = vpop.f32.mrf.mxu0 }
 0xf21   :  { %v4995_v1 = vpop.f32.mrf.mxu1  ;;  %v3026_v19 = vadd.f32 %v3025_v56, %v2949_v2 }
 0xf27   :  { %v3108_v22 = vpop.f32.mrf.mxu0 }
 0xf28   :  { %v3109_v25 = vadd.f32 %v3108_v22, %v3026_v19 }
 0xf29   :  { %v4984_v27 = vpop.f32.mrf.mxu0 }
 0xf2a   :  { %v3184_v28 = vadd.f32 %v3183_v62, %v3109_v25  ;;  %v3214_v62 = vld [vmem:[%s3213_s1] sm:$0x1] }
 0xf2b   :  { %v3221_v2 = vsel %vm71_vm1, %v3214_v62, %v3219_v61 }
 0xf2c   :  { %v3187_v29 = vadd.f32 %v3184_v28, %v2696_v26 }
 0xf2e   :  { %5179 = vtanh.f32 %v3187_v29  ;;  %v4353_v31 = vmul.f32 -1.442695, %v3187_v29 }
 0xf30   :  { %5181 = vpow2.f32 %v4353_v31 }
 0xf3b   :  { %v5180_v30 = vpop.eup %5179 }
 0xf3c   :  { %3197 = vrot.lane.b32.xlu0 %v5180_v30, %s5290_s7 }
 0xf3d   :  { %v5182_v32 = vpop.eup %5181 }
 0xf3e   :  { %v3191_v33 = vadd.f32 1.0, %v5182_v32 }
 0xf40   :  { %5183 = vrcp.f32 %v3191_v33 }
 0xf4d   :  { %v5184_v34 = vpop.eup %5183 }
 0xf4e   :  { %v3195_v37 = vmul.f32 %v5184_v34, %v5763_v43 }
 0xfae   :  { %v3198_v35 = vpop.permute.xlu0 %3197 }
 0xfaf   :  { %v3200_v36 = vmul.f32 %v5184_v34, %v3198_v35 }
 0xfb1   :  { %3202 = vrot.lane.b32.xlu1 %v3200_v36, %s5290_s7 }
0x1023   :  { %v3203_v38 = vpop.permute.xlu1 %3202 }
0x1024   :  { %v5836_v39 = vadd.f32 %v3203_v38, %v3195_v37 }
0x1026   :  { %5185 = vtanh.f32 %v5836_v39 }
0x1033   :  { %v5186_v40 = vpop.eup %5185 }
0x1034   :  { %3208 = vrot.lane.b32.xlu0 %v5186_v40, %s5290_s7 }
0x10a6   :  { %v3209_v41 = vpop.permute.xlu0 %3208 }
0x10a7   :  { %v5840_v42 = vmul.f32 %v5184_v34, %v3209_v41 }
0x10a9   :  { %3223 = vrot.lane.b32.xlu1 %v5840_v42, %s5291_s8  ;;  %v4268_v34 = vrot.slane %v5840_v42, 6 }
0x10ab   :  { %v4281_v38 = vsel %vm4275_vm3, %v5767_v48, %v4268_v34 }
0x111b   :  { %v3224_v44 = vpop.permute.xlu1 %3223 }
0x111c   :  { %v3225_v45 = vsel %vm73_vm2, %v3224_v44, 0 }
0x111d   :  { %v3296_v49 = vand.u32 4294901760, %v3225_v45 }
0x111f   :  { %v3297_v50 = vsub.f32 %v3225_v45, %v3296_v49  ;;  %5016 = vmatmul.mubr.f32.vlgmr.msra.gmra.mxu1 %v3296_v49 }
0x1120   :  { %5030 = vmatpush3.msra.mxu1 %v5329_v4  ;;  %5037 = vmatprep.mubr.msk.f32.mxu1 %vm5289_vm0, %v5288_v3 }
0x1121   :  { %v3298_v43 = vand.u32 4294901760, %v3297_v50  ;;  %5031 = vmatprep.subr.mxu1 %v5288_v3 }
0x1122   :  { %5032 = vmatpush3.msra.mxu1 %v5331_v5 }
0x1123   :  { %v3299_v52 = vsub.f32 %v3297_v50, %v3298_v43  ;;  %5033 = vmatprep.subr.mxu1 %v5288_v3 }
0x1124   :  { %5034 = vmatpush3.msra.mxu1 %v5333_v6 }
0x1125   :  { %v3300_v51 = vand.u32 4294901760, %v3299_v52  ;;  %5035 = vmatprep.subr.mxu1 %v5288_v3 }
0x1126   :  { %5036 = vmatpush3.msra.mxu1 %v5336_v8 }
0x1127   :  { %5038 = vmatmul.mubr.f32.vlgmr.msra.gmra.mxu1 %v3298_v43  ;;  %5051 = vmatprep.subr.mxu1 %v5288_v3 }
0x1128   :  { %5005 = vmatmul.mubr.f32.vlgmr.msra.gmra.mxu0 %v3300_v51  ;;  %5052 = vmatpush3.msra.mxu1 %v5329_v4 }
0x1129   :  { %5019 = vmatpush3.msra.mxu0 %v5344_v9  ;;  %5053 = vmatprep.subr.mxu1 %v5288_v3 }
0x112a   :  { %5020 = vmatprep.subr.mxu0 %v5288_v3  ;;  %5054 = vmatpush3.msra.mxu1 %v5331_v5 }
0x112b   :  { %5021 = vmatpush3.msra.mxu0 %v5347_v10  ;;  %5055 = vmatprep.subr.mxu1 %v5288_v3 }
0x112c   :  { %5022 = vmatprep.subr.mxu0 %v5288_v3  ;;  %5056 = vmatpush3.msra.mxu1 %v5333_v6 }
0x112d   :  { %5023 = vmatpush3.msra.mxu0 %v5350_v11  ;;  %5057 = vmatprep.subr.mxu1 %v5288_v3 }
0x112e   :  { %5024 = vmatprep.subr.mxu0 %v5288_v3  ;;  %5026 = vmatprep.mubr.msk.f32.mxu0 %vm5289_vm0, %v5288_v3 }
0x112f   :  { %5025 = vmatpush3.msra.mxu0 %v5354_v12  ;;  %5058 = vmatpush3.msra.mxu1 %v5336_v8 }
0x1130   :  { %5059 = vmatprep.mubr.msk.f32.mxu1 %vm5289_vm0, %v5288_v3  ;;  %5027 = vmatmul.mubr.f32.vlgmr.msra.gmra.mxu0 %v3297_v50 }
0x1131   :  { %5040 = vmatprep.subr.mxu0 %v5288_v3  ;;  %5060 = vmatmul.mubr.f32.vlgmr.msra.gmra.mxu1 %v3296_v49 }
0x1132   :  { %5041 = vmatpush3.msra.mxu0 %v5358_v13  ;;  %5048 = vmatprep.mubr.msk.f32.mxu0 %vm5289_vm0, %v5288_v3 }
0x1133   :  { %5042 = vmatprep.subr.mxu0 %v5288_v3  ;;  %5073 = vmatprep.subr.mxu1 %v5288_v3 }
0x1134   :  { %5043 = vmatpush3.msra.mxu0 %v5361_v14  ;;  %5074 = vmatpush3.msra.mxu1 %v5379_v20 }
0x1135   :  { %5044 = vmatprep.subr.mxu0 %v5288_v3  ;;  %5075 = vmatprep.subr.mxu1 %v5288_v3 }
0x1136   :  { %5045 = vmatpush3.msra.mxu0 %v5364_v15  ;;  %5076 = vmatpush3.msra.mxu1 %v5381_v21 }
0x1137   :  { %5046 = vmatprep.subr.mxu0 %v5288_v3  ;;  %5077 = vmatprep.subr.mxu1 %v5288_v3 }
0x1138   :  { %5047 = vmatpush3.msra.mxu0 %v5368_v16  ;;  %5078 = vmatpush3.msra.mxu1 %v5389_v23 }
0x1139   :  { %5049 = vmatmul.mubr.f32.vlgmr.msra.gmra.mxu0 %v3296_v49  ;;  %5079 = vmatprep.subr.mxu1 %v5288_v3 }
0x113a   :  { %5080 = vmatpush3.msra.mxu1 %v5395_v24  ;;  %5062 = vmatprep.subr.mxu0 %v5288_v3 }
0x113b   :  { %5081 = vmatprep.mubr.msk.f32.mxu1 %vm5289_vm0, %v5288_v3  ;;  %5095 = vmatprep.subr.mxu1 %v5288_v3 }
0x113c   :  { %5063 = vmatpush3.msra.mxu0 %v5329_v4  ;;  %5070 = vmatprep.mubr.msk.f32.mxu0 %vm5289_vm0, %v5288_v3 }
0x113d   :  { %5064 = vmatprep.subr.mxu0 %v5288_v3 }
0x113e   :  { %5065 = vmatpush3.msra.mxu0 %v5331_v5 }
0x113f   :  { %5066 = vmatprep.subr.mxu0 %v5288_v3 }
0x1140   :  { %5067 = vmatpush3.msra.mxu0 %v5333_v6 }
0x1141   :  { %5068 = vmatprep.subr.mxu0 %v5288_v3 }
0x1142   :  { %5069 = vmatpush3.msra.mxu0 %v5336_v8 }
0x1143   :  { %5084 = vmatprep.subr.mxu0 %v5288_v3 }
0x11df   :  { %v3393_v20 = vpop.f32.mrf.mxu1 }
0x11e1   :  { %v5017_v21 = vpop.f32.mrf.mxu1 }
0x11e7   :  { %v3550_v23 = vpop.f32.mrf.mxu1 }
0x11e8   :  { %v3302_v24 = vpop.f32.mrf.mxu0 }
0x11e9   :  { %v5039_v46 = vpop.f32.mrf.mxu1  ;;  %v3394_v60 = vadd.f32 %v3393_v20, %v3302_v24 }
0x11ea   :  { %v5006_v47 = vpop.f32.mrf.mxu0 }
0x11f0   :  { %v3473_v57 = vpop.f32.mrf.mxu0 }
0x11f1   :  { %v3708_v58 = vpop.f32.mrf.mxu1  ;;  %v3474_v54 = vadd.f32 %v3473_v57, %v3394_v60 }
0x11f2   :  { %v5028_v56 = vpop.f32.mrf.mxu0 }
0x11f3   :  { %v5061_v55 = vpop.f32.mrf.mxu1  ;;  %v3551_v63 = vadd.f32 %v3550_v23, %v3474_v54 }
0x11f9   :  { %v3633_v0 = vpop.f32.mrf.mxu0 }
0x11fa   :  { %v3634_v1 = vadd.f32 %v3633_v0, %v3551_v63 }
0x11fb   :  { %v5050_v7 = vpop.f32.mrf.mxu0 }
0x11fc   :  { %v3709_v17 = vadd.f32 %v3708_v58, %v3634_v1 }
0x11fe   :  { %v3712_v18 = vadd.f32 %v3709_v17, %v3221_v2 }
0x1200   :  { %5187 = vtanh.f32 %v3712_v18  ;;  %v4356_v22 = vmul.f32 -1.442695, %v3712_v18 }
0x1202   :  { %5189 = vpow2.f32 %v4356_v22 }
0x120d   :  { %v5188_v19 = vpop.eup %5187 }
0x120e   :  { %3722 = vrot.lane.b32.xlu0 %v5188_v19, %s5290_s7 }
0x120f   :  { %v5190_v25 = vpop.eup %5189 }
0x1210   :  { %v3716_v26 = vadd.f32 1.0, %v5190_v25 }
0x1212   :  { %5191 = vrcp.f32 %v3716_v26 }
0x121f   :  { %v5192_v27 = vpop.eup %5191 }
0x1220   :  { %v3720_v30 = vmul.f32 %v5192_v27, %v5836_v39 }
0x1280   :  { %v3723_v28 = vpop.permute.xlu0 %3722 }
0x1281   :  { %v3725_v29 = vmul.f32 %v5192_v27, %v3723_v28 }
0x1283   :  { %3727 = vrot.lane.b32.xlu1 %v3725_v29, %s5290_s7 }
0x12f5   :  { %v3728_v31 = vpop.permute.xlu1 %3727 }
0x12f6   :  { %v5909_v32 = vadd.f32 %v3728_v31, %v3720_v30 }
0x12f8   :  { %5193 = vtanh.f32 %v5909_v32 }
0x1305   :  { %v5194_v33 = vpop.eup %5193 }
0x1306   :  { %3733 = vrot.lane.b32.xlu0 %v5194_v33, %s5290_s7 }
0x1378   :  { %v3734_v35 = vpop.permute.xlu0 %3733 }
0x1379   :  { %v3736_v36 = vmul.f32 %v5192_v27, %v3734_v35 }
0x137b   :  { %v4270_v37 = vrot.slane %v3736_v36, 4  ;;  %3748 = vrot.lane.b32.xlu1 %v3736_v36, %s5291_s8 }
0x137d   :  { %v5918_v39 = vsel %vm4277_vm4, %v4281_v38, %v4270_v37 }
0x13ed   :  { %v3749_v40 = vpop.permute.xlu1 %3748 }
0x13ee   :  { %v3750_v41 = vsel %vm73_vm2, %v3749_v40, 0 }
0x13ef   :  { %v3821_v44 = vand.u32 4294901760, %v3750_v41 }
0x13f1   :  { %v3822_v45 = vsub.f32 %v3750_v41, %v3821_v44  ;;  %5082 = vmatmul.mubr.f32.vlgmr.msra.gmra.mxu1 %v3821_v44 }
0x13f2   :  { %5096 = vmatpush3.msra.mxu1 %v5329_v4  ;;  %5103 = vmatprep.mubr.msk.f32.mxu1 %vm5289_vm0, %v5288_v3 }
0x13f3   :  { %v3823_v42 = vand.u32 4294901760, %v3822_v45  ;;  %5097 = vmatprep.subr.mxu1 %v5288_v3 }
0x13f4   :  { %5098 = vmatpush3.msra.mxu1 %v5331_v5 }
0x13f5   :  { %v3824_v48 = vsub.f32 %v3822_v45, %v3823_v42  ;;  %5099 = vmatprep.subr.mxu1 %v5288_v3 }
0x13f6   :  { %5100 = vmatpush3.msra.mxu1 %v5333_v6 }
0x13f7   :  { %v3825_v49 = vand.u32 4294901760, %v3824_v48  ;;  %5101 = vmatprep.subr.mxu1 %v5288_v3 }
0x13f8   :  { %5102 = vmatpush3.msra.mxu1 %v5336_v8 }
0x13f9   :  { %5104 = vmatmul.mubr.f32.vlgmr.msra.gmra.mxu1 %v3823_v42  ;;  %5117 = vmatprep.subr.mxu1 %v5288_v3 }
0x13fa   :  { %5071 = vmatmul.mubr.f32.vlgmr.msra.gmra.mxu0 %v3825_v49  ;;  %5118 = vmatpush3.msra.mxu1 %v5329_v4 }
0x13fb   :  { %5085 = vmatpush3.msra.mxu0 %v5344_v9  ;;  %5119 = vmatprep.subr.mxu1 %v5288_v3 }
0x13fc   :  { %5086 = vmatprep.subr.mxu0 %v5288_v3  ;;  %5120 = vmatpush3.msra.mxu1 %v5331_v5 }
0x13fd   :  { %5087 = vmatpush3.msra.mxu0 %v5347_v10  ;;  %5121 = vmatprep.subr.mxu1 %v5288_v3 }
0x13fe   :  { %5088 = vmatprep.subr.mxu0 %v5288_v3  ;;  %5122 = vmatpush3.msra.mxu1 %v5333_v6 }
0x13ff   :  { %5089 = vmatpush3.msra.mxu0 %v5350_v11  ;;  %5123 = vmatprep.subr.mxu1 %v5288_v3 }
0x1400   :  { %5090 = vmatprep.subr.mxu0 %v5288_v3  ;;  %5092 = vmatprep.mubr.msk.f32.mxu0 %vm5289_vm0, %v5288_v3 }
0x1401   :  { %5091 = vmatpush3.msra.mxu0 %v5354_v12  ;;  %5124 = vmatpush3.msra.mxu1 %v5336_v8 }
0x1402   :  { %5125 = vmatprep.mubr.msk.f32.mxu1 %vm5289_vm0, %v5288_v3  ;;  %5093 = vmatmul.mubr.f32.vlgmr.msra.gmra.mxu0 %v3822_v45 }
0x1403   :  { %5106 = vmatprep.subr.mxu0 %v5288_v3  ;;  %5126 = vmatmul.mubr.f32.vlgmr.msra.gmra.mxu1 %v3821_v44 }
0x1404   :  { %5107 = vmatpush3.msra.mxu0 %v5358_v13  ;;  %5114 = vmatprep.mubr.msk.f32.mxu0 %vm5289_vm0, %v5288_v3 }
0x1405   :  { %5108 = vmatprep.subr.mxu0 %v5288_v3 }
0x1406   :  { %5109 = vmatpush3.msra.mxu0 %v5361_v14 }
0x1407   :  { %5110 = vmatprep.subr.mxu0 %v5288_v3 }
0x1408   :  { %5111 = vmatpush3.msra.mxu0 %v5364_v15  ;;  %v3742_v15 = vld [vmem:[%s3741_s6] sm:$0x1] }
0x1409   :  { %5112 = vmatprep.subr.mxu0 %v5288_v3  ;;  %v3744_v3 = vrot.slane %v3742_v15, 7 }
0x140a   :  { %5113 = vmatpush3.msra.mxu0 %v5368_v16  ;;  %v3739_v16 = vld [vmem:[%s3738_s9] sm:$0x1] }
0x140b   :  { %5115 = vmatmul.mubr.f32.vlgmr.msra.gmra.mxu0 %v3821_v44  ;;  %v3746_v21 = vsel %vm71_vm1, %v3739_v16, %v3744_v3 }
0x14b1   :  { %v3918_v4 = vpop.f32.mrf.mxu1 }
0x14b3   :  { %v5083_v5 = vpop.f32.mrf.mxu1 }
0x14b9   :  { %v4075_v6 = vpop.f32.mrf.mxu1 }
0x14ba   :  { %v3827_v8 = vpop.f32.mrf.mxu0 }
0x14bb   :  { %v5105_v9 = vpop.f32.mrf.mxu1  ;;  %v3919_v13 = vadd.f32 %v3918_v4, %v3827_v8 }
0x14bc   :  { %v5072_v10 = vpop.f32.mrf.mxu0 }
0x14c2   :  { %v3998_v11 = vpop.f32.mrf.mxu0 }
0x14c3   :  { %v4233_v12 = vpop.f32.mrf.mxu1  ;;  %v3999_v43 = vadd.f32 %v3998_v11, %v3919_v13 }
0x14c4   :  { %v5094_v14 = vpop.f32.mrf.mxu0 }
0x14c5   :  { %v5127_v50 = vpop.f32.mrf.mxu1  ;;  %v4076_v52 = vadd.f32 %v4075_v6, %v3999_v43 }
0x14cb   :  { %v4158_v51 = vpop.f32.mrf.mxu0 }
0x14cc   :  { %v4159_v20 = vadd.f32 %v4158_v51, %v4076_v52 }
0x14cd   :  { %v5116_v23 = vpop.f32.mrf.mxu0 }
0x14ce   :  { %v4234_v24 = vadd.f32 %v4233_v12, %v4159_v20 }
0x14d0   :  { %v4237_v46 = vadd.f32 %v4234_v24, %v3746_v21 }
0x14d2   :  { %5195 = vtanh.f32 %v4237_v46  ;;  %v4359_v57 = vmul.f32 -1.442695, %v4237_v46 }
0x14d4   :  { %5197 = vpow2.f32 %v4359_v57 }
0x14df   :  { %v5196_v47 = vpop.eup %5195 }
0x14e0   :  { %4247 = vrot.lane.b32.xlu0 %v5196_v47, %s5290_s7 }
0x14e1   :  { %v5198_v58 = vpop.eup %5197 }
0x14e2   :  { %v4241_v60 = vadd.f32 1.0, %v5198_v58 }
0x14e4   :  { %5199 = vrcp.f32 %v4241_v60 }
0x14f1   :  { %v5200_v56 = vpop.eup %5199 }
0x14f2   :  { %v4245_v59 = vmul.f32 %v5200_v56, %v5909_v32 }
0x1552   :  { %v4248_v55 = vpop.permute.xlu0 %4247 }
0x1553   :  { %v4250_v54 = vmul.f32 %v5200_v56, %v4248_v55 }
0x1555   :  { %4252 = vrot.lane.b32.xlu1 %v4250_v54, %s5290_s7 }
0x15c7   :  { %v4253_v61 = vpop.permute.xlu1 %4252 }
0x15c8   :  { %v4255_v62 = vadd.f32 %v4253_v61, %v4245_v59 }
0x15ca   :  { %5201 = vtanh.f32 %v4255_v62  ;;  %4295 = vrot.lane.b32.xlu1 %v4255_v62, %s5292_s10 }
0x15d7   :  { %v5202_v63 = vpop.eup %5201 }
0x15d8   :  { %4258 = vrot.lane.b32.xlu0 %v5202_v63, %s5290_s7 }
0x15dc   :  { %4286 = vrot.lane.b32.xlu0 %v5696_v53, %s5291_s8 }
0x163c   :  { %v4296_v0 = vpop.permute.xlu1 %4295 }
0x163d   :  { %4299 = vst.msk [vmem:[#allocation9] sm:$0x3] %vm4298_vm6, %v4296_v0 }
0x163e   :  { %5266 = shalt.err (!%p5263_p5)
}
0x163f   :  { %4311 = dma.vmem_to_hbm [thread:$0]  %s4309_s12, 32, %s5984_s4, [#allocation4]  }
0x164a   :  { %v4259_v1 = vpop.permute.xlu0 %4258 }
0x164b   :  { %v4261_v2 = vmul.f32 %v5200_v56, %v4259_v1 }
0x164d   :  { %v4273_v53 = vrot.slane %v4261_v2, 2 }
0x164e   :  { %v4287_v7 = vpop.permute.xlu0 %4286 }
0x164f   :  { %4292 = vst.msk [vmem:[%s5983_s3] sm:$0xff] %vm73_vm2, %v4287_v7  ;;  %v4283_v17 = vsel %vm4279_vm5, %v5918_v39, %v4273_v53 }
0x1650   :  { %4288 = vrot.lane.b32.xlu1 %v4283_v17, %s5291_s8 }
0x16c2   :  { %v4289_v18 = vpop.permute.xlu1 %4288 }
0x16c3   :  { %4293 = vst.msk [vmem:[%s5983_s3 + $0x8] sm:$0xff] %vm73_vm2, %v4289_v18 }
0x16c4   :  { %5281 = dma.done.wait [#allocation4], 32  }
0x16c5   :  { %5282 = vsyncadd [#allocation4], 4294967264 }
0x16c6   :  { %4317 = vsyncpa [#allocation3], 1 }
0x16c7   :  { %4318 = vsyncpa [#allocation8], 1 }
0x16c8   :  { %4319 = vsyncpa [#allocation4], 1 }
0x16c9   :  { %4320 = vsyncpa [#allocation5], 1 }

</bundles_post_ra>
